<compile_context>
chip_gen: v7x
topology: tpu7x:2x2x1
jax: 0.10.0
libtpu: 0.0.40
codegen_flags: <defaults>
</compile_context>

<pallas_src>
import functools

import jax
import jax.numpy as jnp
from jax.experimental import pallas as pl
from jax.experimental.pallas import tpu as pltpu


def _round_up(n: int, m: int) -> int:
    return ((n + m - 1) // m) * m


def _parallel_net_kernel(x_ref, w_open_ref, b_open_ref, w_steps_ref, b_steps_ref,
                         w_close_ref, out_ref, *, local_steps, dt):
    cdt = w_open_ref.dtype  # matmul compute dtype (f32 or bf16)

    # OpenLayer: tanh(x @ W_open + b_open); accumulate in f32, keep h in f32.
    h = jnp.tanh(
        jnp.dot(x_ref[...], w_open_ref[...], preferred_element_type=jnp.float32)
        + b_open_ref[...]
    )

    # LayerParallel(StepLayer): forward-Euler ODE steps, distinct weights per step.
    # Matmul operands in compute dtype; bias add / tanh / axpy stay f32 (v5e-safe).
    for s in range(local_steps):
        z = jnp.dot(h.astype(cdt), w_steps_ref[s],
                    preferred_element_type=jnp.float32) + b_steps_ref[s]
        h = h + dt * jnp.tanh(z)

    # CloseLayer: h @ W_close (no bias). opad is a multiple of 128 -> lane-dense store.
    out_ref[...] = jnp.dot(
        h.astype(cdt), w_close_ref[...], preferred_element_type=jnp.float32
    ).astype(out_ref.dtype)


def parallel_net_forward(x, w_open, b_open, w_steps, b_steps, w_close,
                         *, Tf=1.0, batch_tile=256, compute_dtype=jnp.float32):
    """Forward pass of ParallelNet.

    x:        [B, input_size] float32
    w_open:   [input_size, width]          (transpose of nn.Linear weight)
    b_open:   [1, width]
    w_steps:  [local_steps, width, width]  (transposed per step)
    b_steps:  [local_steps, 1, width]
    w_close:  [width, output_size]         (transposed, no bias)
    """
    B, input_size = x.shape
    width = w_open.shape[1]
    output_size = w_close.shape[1]
    local_steps = w_steps.shape[0]
    dt = float(Tf) / float(local_steps)

    LANE, SUB = 128, 8

    # --- pad every feature axis to a full 128-lane vreg; pad batch to the tile ---
    ipad = _round_up(input_size, LANE)
    wpad = _round_up(width, LANE)
    opad = _round_up(output_size, LANE)

    bt = _round_up(max(SUB, min(int(batch_tile), _round_up(B, SUB))), SUB)
    Bp = _round_up(B, bt)
    grid = (Bp // bt,)

    f32 = jnp.float32
    xp = jnp.zeros((Bp, ipad), f32).at[:B, :input_size].set(x).astype(compute_dtype)
    w_open_p = jnp.zeros((ipad, wpad), compute_dtype).at[:input_size, :width].set(
        w_open.astype(compute_dtype))
    b_open_p = jnp.zeros((1, wpad), f32).at[:, :width].set(b_open.astype(f32))
    w_steps_p = jnp.zeros((local_steps, wpad, wpad), compute_dtype).at[:, :width, :width].set(
        w_steps.astype(compute_dtype))
    b_steps_p = jnp.zeros((local_steps, 1, wpad), f32).at[:, :, :width].set(
        b_steps.astype(f32))
    w_close_p = jnp.zeros((wpad, opad), compute_dtype).at[:width, :output_size].set(
        w_close.astype(compute_dtype))

    # --- cost estimate for the XLA scheduler (padded = actual work done) ---
    flops = 2 * Bp * (ipad * wpad + local_steps * wpad * wpad + wpad * opad)
    transcendentals = Bp * wpad * (local_steps + 1)
    bytes_accessed = (xp.nbytes + w_open_p.nbytes + b_open_p.nbytes + w_steps_p.nbytes
                      + b_steps_p.nbytes + w_close_p.nbytes + Bp * opad * 4)
    cost = pl.CostEstimate(flops=int(flops),
                           transcendentals=int(transcendentals),
                           bytes_accessed=int(bytes_accessed))

    # --- VMEM budget: double-buffered activation tiles + resident weights + headroom,
    #     capped for v7x (64 MiB physical VMEM per TensorCore) ---
    cbytes = jnp.dtype(compute_dtype).itemsize
    block_bytes = (2 * (bt * ipad * cbytes + bt * opad * 4)
                   + 2 * (w_open_p.nbytes + b_open_p.nbytes + w_steps_p.nbytes
                          + b_steps_p.nbytes + w_close_p.nbytes))
    vmem_limit = int(min(max(4 * block_bytes, 32 * 1024 * 1024), 48 * 1024 * 1024))

    kernel = functools.partial(_parallel_net_kernel, local_steps=local_steps, dt=dt)

    out_padded = pl.pallas_call(
        kernel,
        out_shape=jax.ShapeDtypeStruct((Bp, opad), jnp.float32),
        grid_spec=pltpu.PrefetchScalarGridSpec(
            num_scalar_prefetch=0,
            grid=grid,
            in_specs=[
                pl.BlockSpec((bt, ipad), lambda i: (i, 0)),                   # x tile
                pl.BlockSpec((ipad, wpad), lambda i: (0, 0)),                 # W_open
                pl.BlockSpec((1, wpad), lambda i: (0, 0)),                    # b_open
                pl.BlockSpec((local_steps, wpad, wpad), lambda i: (0, 0, 0)), # W_steps
                pl.BlockSpec((local_steps, 1, wpad), lambda i: (0, 0, 0)),    # b_steps
                pl.BlockSpec((wpad, opad), lambda i: (0, 0)),                 # W_close
            ],
            out_specs=pl.BlockSpec((bt, opad), lambda i: (i, 0)),
        ),
        compiler_params=pltpu.CompilerParams(
            dimension_semantics=("parallel",),
            vmem_limit_bytes=vmem_limit,
        ),
        cost_estimate=cost,
    )(xp, w_open_p, b_open_p, w_steps_p, b_steps_p, w_close_p)

    return out_padded[:B, :output_size]


def _reference_forward(x, w_open, b_open, w_steps, b_steps, w_close,
                       *, Tf=1.0, compute_dtype=jnp.float32):
    """Pure-JAX reference; compute_dtype mirrors the kernel's matmul quantization."""
    local_steps = w_steps.shape[0]
    dt = Tf / local_steps
    cd = compute_dtype

    def mm(a, b):
        return jnp.dot(a.astype(cd), b.astype(cd), preferred_element_type=jnp.float32)

    h = jnp.tanh(mm(x, w_open) + b_open)
    for s in range(local_steps):
        h = h + dt * jnp.tanh(mm(h, w_steps[s]) + b_steps[s])
    return mm(h, w_close)


if __name__ == "__main__":
    # Small shapes consistent with the module's forward: x is [batch, input_size].
    batch = 32
    input_size = 16
    width = 32
    output_size = 8
    local_steps = 8
    Tf = 1.0

    key = jax.random.PRNGKey(0)
    kx, ko, kbo, ks, kbs, kc = jax.random.split(key, 6)

    # Deterministic parameter init (scaled normals); weights stored as [in, out]
    # (i.e. the transpose of PyTorch's nn.Linear weight layout).
    w_open = 0.1 * jax.random.normal(ko, (input_size, width), dtype=jnp.float32)
    b_open = 0.1 * jax.random.normal(kbo, (1, width), dtype=jnp.float32)
    w_steps = 0.1 * jax.random.normal(ks, (local_steps, width, width), dtype=jnp.float32)
    b_steps = 0.1 * jax.random.normal(kbs, (local_steps, 1, width), dtype=jnp.float32)
    w_close = 0.1 * jax.random.normal(kc, (width, output_size), dtype=jnp.float32)

    x = jax.random.normal(kx, (batch, input_size), dtype=jnp.float32)

    out = parallel_net_forward(
        x, w_open, b_open, w_steps, b_steps, w_close,
        Tf=Tf, batch_tile=256, compute_dtype=jnp.float32)
    out = jax.block_until_ready(out)

    ref = _reference_forward(
        x, w_open, b_open, w_steps, b_steps, w_close,
        Tf=Tf, compute_dtype=jnp.float32)

    assert out.shape == (batch, output_size), f"bad shape {out.shape}"
    assert jnp.allclose(out, ref, atol=1e-5, rtol=1e-5), "mismatch vs reference"

    print("KERNEL_OK")
</pallas_src>

<mosaic_0001>
module attributes {stable_mosaic.version = 11 : i64} {
  func.func @_parallel_net_kernel(%arg0: i32, %arg1: memref<32x128xf32, #tpu.memory_space<vmem>>, %arg2: memref<128x128xf32, #tpu.memory_space<vmem>>, %arg3: memref<1x128xf32, #tpu.memory_space<vmem>>, %arg4: memref<8x128x128xf32, #tpu.memory_space<vmem>>, %arg5: memref<8x1x128xf32, #tpu.memory_space<vmem>>, %arg6: memref<128x128xf32, #tpu.memory_space<vmem>>, %arg7: memref<32x128xf32, #tpu.memory_space<vmem>>) attributes {dimension_semantics = [#tpu.dimension_semantics<parallel>], iteration_bounds = array<i64: 1>, scalar_prefetch = 0 : i64, scratch_operands = 0 : i64, tpu.core_type = #tpu.core_type<tc>, window_params = [{transform_indices = @transform_0, window_bounds = array<i64: 32, 128>}, {pipeline_mode = #tpu.pipeline_mode<synchronous>, transform_indices = @transform_1, window_bounds = array<i64: 128, 128>}, {pipeline_mode = #tpu.pipeline_mode<synchronous>, transform_indices = @transform_2, window_bounds = array<i64: 1, 128>}, {pipeline_mode = #tpu.pipeline_mode<synchronous>, transform_indices = @transform_3, window_bounds = array<i64: 8, 128, 128>}, {pipeline_mode = #tpu.pipeline_mode<synchronous>, transform_indices = @transform_4, window_bounds = array<i64: 8, 1, 128>}, {pipeline_mode = #tpu.pipeline_mode<synchronous>, transform_indices = @transform_5, window_bounds = array<i64: 128, 128>}, {transform_indices = @transform_6, window_bounds = array<i64: 32, 128>}]} {
    %c0 = arith.constant 0 : index
    %c0_0 = arith.constant 0 : index
    %0 = vector.load %arg1[%c0, %c0_0] : memref<32x128xf32, #tpu.memory_space<vmem>>, vector<32x128xf32>
    %c0_1 = arith.constant 0 : index
    %c0_2 = arith.constant 0 : index
    %1 = vector.load %arg2[%c0_1, %c0_2] : memref<128x128xf32, #tpu.memory_space<vmem>>, vector<128x128xf32>
    %cst = arith.constant dense<0.000000e+00> : vector<32x128xf32>
    %2 = tpu.matmul %0, %1, %cst {dimension_numbers = #tpu.dot_dimension_numbers<[1], [0], [0], [1], [0, 0, 1, 1], [], []>} : vector<32x128xf32>, vector<128x128xf32>, vector<32x128xf32> -> vector<32x128xf32>
    %c0_3 = arith.constant 0 : index
    %c0_4 = arith.constant 0 : index
    %3 = vector.load %arg3[%c0_3, %c0_4] : memref<1x128xf32, #tpu.memory_space<vmem>>, vector<1x128xf32>
    %4 = vector.broadcast %3 : vector<1x128xf32> to vector<32x128xf32>
    %5 = arith.addf %2, %4 : vector<32x128xf32>
    %6 = math.tanh %5 : vector<32x128xf32>
    %c0_5 = arith.constant 0 : index
    %c0_6 = arith.constant 0 : index
    %c0_7 = arith.constant 0 : index
    %7 = vector.load %arg4[%c0_5, %c0_6, %c0_7] : memref<8x128x128xf32, #tpu.memory_space<vmem>>, vector<1x128x128xf32>
    %8 = vector.shape_cast %7 : vector<1x128x128xf32> to vector<128x128xf32>
    %cst_8 = arith.constant dense<0.000000e+00> : vector<32x128xf32>
    %9 = tpu.matmul %6, %8, %cst_8 {dimension_numbers = #tpu.dot_dimension_numbers<[1], [0], [0], [1], [0, 0, 1, 1], [], []>} : vector<32x128xf32>, vector<128x128xf32>, vector<32x128xf32> -> vector<32x128xf32>
    %c0_9 = arith.constant 0 : index
    %c0_10 = arith.constant 0 : index
    %c0_11 = arith.constant 0 : index
    %10 = vector.load %arg5[%c0_9, %c0_10, %c0_11] : memref<8x1x128xf32, #tpu.memory_space<vmem>>, vector<1x1x128xf32>
    %11 = vector.shape_cast %10 : vector<1x1x128xf32> to vector<1x128xf32>
    %12 = vector.broadcast %11 : vector<1x128xf32> to vector<32x128xf32>
    %13 = arith.addf %9, %12 : vector<32x128xf32>
    %14 = math.tanh %13 : vector<32x128xf32>
    %cst_12 = arith.constant 1.250000e-01 : f32
    %15 = vector.broadcast %cst_12 : f32 to vector<32x128xf32>
    %16 = arith.mulf %15, %14 : vector<32x128xf32>
    %17 = arith.addf %6, %16 : vector<32x128xf32>
    %c1 = arith.constant 1 : index
    %c0_13 = arith.constant 0 : index
    %c0_14 = arith.constant 0 : index
    %18 = vector.load %arg4[%c1, %c0_13, %c0_14] : memref<8x128x128xf32, #tpu.memory_space<vmem>>, vector<1x128x128xf32>
    %19 = vector.shape_cast %18 : vector<1x128x128xf32> to vector<128x128xf32>
    %cst_15 = arith.constant dense<0.000000e+00> : vector<32x128xf32>
    %20 = tpu.matmul %17, %19, %cst_15 {dimension_numbers = #tpu.dot_dimension_numbers<[1], [0], [0], [1], [0, 0, 1, 1], [], []>} : vector<32x128xf32>, vector<128x128xf32>, vector<32x128xf32> -> vector<32x128xf32>
    %c1_16 = arith.constant 1 : index
    %c0_17 = arith.constant 0 : index
    %c0_18 = arith.constant 0 : index
    %21 = vector.load %arg5[%c1_16, %c0_17, %c0_18] : memref<8x1x128xf32, #tpu.memory_space<vmem>>, vector<1x1x128xf32>
    %22 = vector.shape_cast %21 : vector<1x1x128xf32> to vector<1x128xf32>
    %23 = vector.broadcast %22 : vector<1x128xf32> to vector<32x128xf32>
    %24 = arith.addf %20, %23 : vector<32x128xf32>
    %25 = math.tanh %24 : vector<32x128xf32>
    %cst_19 = arith.constant 1.250000e-01 : f32
    %26 = vector.broadcast %cst_19 : f32 to vector<32x128xf32>
    %27 = arith.mulf %26, %25 : vector<32x128xf32>
    %28 = arith.addf %17, %27 : vector<32x128xf32>
    %c2 = arith.constant 2 : index
    %c0_20 = arith.constant 0 : index
    %c0_21 = arith.constant 0 : index
    %29 = vector.load %arg4[%c2, %c0_20, %c0_21] : memref<8x128x128xf32, #tpu.memory_space<vmem>>, vector<1x128x128xf32>
    %30 = vector.shape_cast %29 : vector<1x128x128xf32> to vector<128x128xf32>
    %cst_22 = arith.constant dense<0.000000e+00> : vector<32x128xf32>
    %31 = tpu.matmul %28, %30, %cst_22 {dimension_numbers = #tpu.dot_dimension_numbers<[1], [0], [0], [1], [0, 0, 1, 1], [], []>} : vector<32x128xf32>, vector<128x128xf32>, vector<32x128xf32> -> vector<32x128xf32>
    %c2_23 = arith.constant 2 : index
    %c0_24 = arith.constant 0 : index
    %c0_25 = arith.constant 0 : index
    %32 = vector.load %arg5[%c2_23, %c0_24, %c0_25] : memref<8x1x128xf32, #tpu.memory_space<vmem>>, vector<1x1x128xf32>
    %33 = vector.shape_cast %32 : vector<1x1x128xf32> to vector<1x128xf32>
    %34 = vector.broadcast %33 : vector<1x128xf32> to vector<32x128xf32>
    %35 = arith.addf %31, %34 : vector<32x128xf32>
    %36 = math.tanh %35 : vector<32x128xf32>
    %cst_26 = arith.constant 1.250000e-01 : f32
    %37 = vector.broadcast %cst_26 : f32 to vector<32x128xf32>
    %38 = arith.mulf %37, %36 : vector<32x128xf32>
    %39 = arith.addf %28, %38 : vector<32x128xf32>
    %c3 = arith.constant 3 : index
    %c0_27 = arith.constant 0 : index
    %c0_28 = arith.constant 0 : index
    %40 = vector.load %arg4[%c3, %c0_27, %c0_28] : memref<8x128x128xf32, #tpu.memory_space<vmem>>, vector<1x128x128xf32>
    %41 = vector.shape_cast %40 : vector<1x128x128xf32> to vector<128x128xf32>
    %cst_29 = arith.constant dense<0.000000e+00> : vector<32x128xf32>
    %42 = tpu.matmul %39, %41, %cst_29 {dimension_numbers = #tpu.dot_dimension_numbers<[1], [0], [0], [1], [0, 0, 1, 1], [], []>} : vector<32x128xf32>, vector<128x128xf32>, vector<32x128xf32> -> vector<32x128xf32>
    %c3_30 = arith.constant 3 : index
    %c0_31 = arith.constant 0 : index
    %c0_32 = arith.constant 0 : index
    %43 = vector.load %arg5[%c3_30, %c0_31, %c0_32] : memref<8x1x128xf32, #tpu.memory_space<vmem>>, vector<1x1x128xf32>
    %44 = vector.shape_cast %43 : vector<1x1x128xf32> to vector<1x128xf32>
    %45 = vector.broadcast %44 : vector<1x128xf32> to vector<32x128xf32>
    %46 = arith.addf %42, %45 : vector<32x128xf32>
    %47 = math.tanh %46 : vector<32x128xf32>
    %cst_33 = arith.constant 1.250000e-01 : f32
    %48 = vector.broadcast %cst_33 : f32 to vector<32x128xf32>
    %49 = arith.mulf %48, %47 : vector<32x128xf32>
    %50 = arith.addf %39, %49 : vector<32x128xf32>
    %c4 = arith.constant 4 : index
    %c0_34 = arith.constant 0 : index
    %c0_35 = arith.constant 0 : index
    %51 = vector.load %arg4[%c4, %c0_34, %c0_35] : memref<8x128x128xf32, #tpu.memory_space<vmem>>, vector<1x128x128xf32>
    %52 = vector.shape_cast %51 : vector<1x128x128xf32> to vector<128x128xf32>
    %cst_36 = arith.constant dense<0.000000e+00> : vector<32x128xf32>
    %53 = tpu.matmul %50, %52, %cst_36 {dimension_numbers = #tpu.dot_dimension_numbers<[1], [0], [0], [1], [0, 0, 1, 1], [], []>} : vector<32x128xf32>, vector<128x128xf32>, vector<32x128xf32> -> vector<32x128xf32>
    %c4_37 = arith.constant 4 : index
    %c0_38 = arith.constant 0 : index
    %c0_39 = arith.constant 0 : index
    %54 = vector.load %arg5[%c4_37, %c0_38, %c0_39] : memref<8x1x128xf32, #tpu.memory_space<vmem>>, vector<1x1x128xf32>
    %55 = vector.shape_cast %54 : vector<1x1x128xf32> to vector<1x128xf32>
    %56 = vector.broadcast %55 : vector<1x128xf32> to vector<32x128xf32>
    %57 = arith.addf %53, %56 : vector<32x128xf32>
    %58 = math.tanh %57 : vector<32x128xf32>
    %cst_40 = arith.constant 1.250000e-01 : f32
    %59 = vector.broadcast %cst_40 : f32 to vector<32x128xf32>
    %60 = arith.mulf %59, %58 : vector<32x128xf32>
    %61 = arith.addf %50, %60 : vector<32x128xf32>
    %c5 = arith.constant 5 : index
    %c0_41 = arith.constant 0 : index
    %c0_42 = arith.constant 0 : index
    %62 = vector.load %arg4[%c5, %c0_41, %c0_42] : memref<8x128x128xf32, #tpu.memory_space<vmem>>, vector<1x128x128xf32>
    %63 = vector.shape_cast %62 : vector<1x128x128xf32> to vector<128x128xf32>
    %cst_43 = arith.constant dense<0.000000e+00> : vector<32x128xf32>
    %64 = tpu.matmul %61, %63, %cst_43 {dimension_numbers = #tpu.dot_dimension_numbers<[1], [0], [0], [1], [0, 0, 1, 1], [], []>} : vector<32x128xf32>, vector<128x128xf32>, vector<32x128xf32> -> vector<32x128xf32>
    %c5_44 = arith.constant 5 : index
    %c0_45 = arith.constant 0 : index
    %c0_46 = arith.constant 0 : index
    %65 = vector.load %arg5[%c5_44, %c0_45, %c0_46] : memref<8x1x128xf32, #tpu.memory_space<vmem>>, vector<1x1x128xf32>
    %66 = vector.shape_cast %65 : vector<1x1x128xf32> to vector<1x128xf32>
    %67 = vector.broadcast %66 : vector<1x128xf32> to vector<32x128xf32>
    %68 = arith.addf %64, %67 : vector<32x128xf32>
    %69 = math.tanh %68 : vector<32x128xf32>
    %cst_47 = arith.constant 1.250000e-01 : f32
    %70 = vector.broadcast %cst_47 : f32 to vector<32x128xf32>
    %71 = arith.mulf %70, %69 : vector<32x128xf32>
    %72 = arith.addf %61, %71 : vector<32x128xf32>
    %c6 = arith.constant 6 : index
    %c0_48 = arith.constant 0 : index
    %c0_49 = arith.constant 0 : index
    %73 = vector.load %arg4[%c6, %c0_48, %c0_49] : memref<8x128x128xf32, #tpu.memory_space<vmem>>, vector<1x128x128xf32>
    %74 = vector.shape_cast %73 : vector<1x128x128xf32> to vector<128x128xf32>
    %cst_50 = arith.constant dense<0.000000e+00> : vector<32x128xf32>
    %75 = tpu.matmul %72, %74, %cst_50 {dimension_numbers = #tpu.dot_dimension_numbers<[1], [0], [0], [1], [0, 0, 1, 1], [], []>} : vector<32x128xf32>, vector<128x128xf32>, vector<32x128xf32> -> vector<32x128xf32>
    %c6_51 = arith.constant 6 : index
    %c0_52 = arith.constant 0 : index
    %c0_53 = arith.constant 0 : index
    %76 = vector.load %arg5[%c6_51, %c0_52, %c0_53] : memref<8x1x128xf32, #tpu.memory_space<vmem>>, vector<1x1x128xf32>
    %77 = vector.shape_cast %76 : vector<1x1x128xf32> to vector<1x128xf32>
    %78 = vector.broadcast %77 : vector<1x128xf32> to vector<32x128xf32>
    %79 = arith.addf %75, %78 : vector<32x128xf32>
    %80 = math.tanh %79 : vector<32x128xf32>
    %cst_54 = arith.constant 1.250000e-01 : f32
    %81 = vector.broadcast %cst_54 : f32 to vector<32x128xf32>
    %82 = arith.mulf %81, %80 : vector<32x128xf32>
    %83 = arith.addf %72, %82 : vector<32x128xf32>
    %c7 = arith.constant 7 : index
    %c0_55 = arith.constant 0 : index
    %c0_56 = arith.constant 0 : index
    %84 = vector.load %arg4[%c7, %c0_55, %c0_56] : memref<8x128x128xf32, #tpu.memory_space<vmem>>, vector<1x128x128xf32>
    %85 = vector.shape_cast %84 : vector<1x128x128xf32> to vector<128x128xf32>
    %cst_57 = arith.constant dense<0.000000e+00> : vector<32x128xf32>
    %86 = tpu.matmul %83, %85, %cst_57 {dimension_numbers = #tpu.dot_dimension_numbers<[1], [0], [0], [1], [0, 0, 1, 1], [], []>} : vector<32x128xf32>, vector<128x128xf32>, vector<32x128xf32> -> vector<32x128xf32>
    %c7_58 = arith.constant 7 : index
    %c0_59 = arith.constant 0 : index
    %c0_60 = arith.constant 0 : index
    %87 = vector.load %arg5[%c7_58, %c0_59, %c0_60] : memref<8x1x128xf32, #tpu.memory_space<vmem>>, vector<1x1x128xf32>
    %88 = vector.shape_cast %87 : vector<1x1x128xf32> to vector<1x128xf32>
    %89 = vector.broadcast %88 : vector<1x128xf32> to vector<32x128xf32>
    %90 = arith.addf %86, %89 : vector<32x128xf32>
    %91 = math.tanh %90 : vector<32x128xf32>
    %cst_61 = arith.constant 1.250000e-01 : f32
    %92 = vector.broadcast %cst_61 : f32 to vector<32x128xf32>
    %93 = arith.mulf %92, %91 : vector<32x128xf32>
    %94 = arith.addf %83, %93 : vector<32x128xf32>
    %c0_62 = arith.constant 0 : index
    %c0_63 = arith.constant 0 : index
    %95 = vector.load %arg6[%c0_62, %c0_63] : memref<128x128xf32, #tpu.memory_space<vmem>>, vector<128x128xf32>
    %cst_64 = arith.constant dense<0.000000e+00> : vector<32x128xf32>
    %96 = tpu.matmul %94, %95, %cst_64 {dimension_numbers = #tpu.dot_dimension_numbers<[1], [0], [0], [1], [0, 0, 1, 1], [], []>} : vector<32x128xf32>, vector<128x128xf32>, vector<32x128xf32> -> vector<32x128xf32>
    %c0_65 = arith.constant 0 : index
    %c0_66 = arith.constant 0 : index
    %97 = vector.load %arg7[%c0_65, %c0_66] : memref<32x128xf32, #tpu.memory_space<vmem>>, vector<32x128xf32>
    tpu.vector_store %arg7[%c0_65, %c0_66], %96 {strides = array<i32>} : memref<32x128xf32, #tpu.memory_space<vmem>>, vector<32x128xf32>,
    return
  }
  func.func @transform_0(%arg0: i32) -> (i32, i32) {
    %c0_i32 = arith.constant 0 : i32
    %c0_i32_0 = arith.constant 0 : i32
    return %arg0, %c0_i32 : i32, i32
  }
  func.func @transform_1(%arg0: i32) -> (i32, i32) {
    %c0_i32 = arith.constant 0 : i32
    %c0_i32_0 = arith.constant 0 : i32
    %c0_i32_1 = arith.constant 0 : i32
    return %c0_i32, %c0_i32_0 : i32, i32
  }
  func.func @transform_2(%arg0: i32) -> (i32, i32) {
    %c0_i32 = arith.constant 0 : i32
    %c0_i32_0 = arith.constant 0 : i32
    %c0_i32_1 = arith.constant 0 : i32
    return %c0_i32, %c0_i32_0 : i32, i32
  }
  func.func @transform_3(%arg0: i32) -> (i32, i32, i32) {
    %c0_i32 = arith.constant 0 : i32
    %c0_i32_0 = arith.constant 0 : i32
    %c0_i32_1 = arith.constant 0 : i32
    %c0_i32_2 = arith.constant 0 : i32
    return %c0_i32, %c0_i32_0, %c0_i32_1 : i32, i32, i32
  }
  func.func @transform_4(%arg0: i32) -> (i32, i32, i32) {
    %c0_i32 = arith.constant 0 : i32
    %c0_i32_0 = arith.constant 0 : i32
    %c0_i32_1 = arith.constant 0 : i32
    %c0_i32_2 = arith.constant 0 : i32
    return %c0_i32, %c0_i32_0, %c0_i32_1 : i32, i32, i32
  }
  func.func @transform_5(%arg0: i32) -> (i32, i32) {
    %c0_i32 = arith.constant 0 : i32
    %c0_i32_0 = arith.constant 0 : i32
    %c0_i32_1 = arith.constant 0 : i32
    return %c0_i32, %c0_i32_0 : i32, i32
  }
  func.func @transform_6(%arg0: i32) -> (i32, i32) {
    %c0_i32 = arith.constant 0 : i32
    %c0_i32_0 = arith.constant 0 : i32
    return %arg0, %c0_i32 : i32, i32
  }
}

</mosaic_0001>

<bundles_post_ra>
// kernel: tpu_custom_call.1
= control target key start
LH: loop header
LB: loop body
LE: loop exit
PB: predicated region body
PF: predicated region fallthrough
CT: control target
= control target key end

     0   :  { %11 = vsyncpa [#allocation3], 0  ;;  %s2676_s0 = inlined_call_operand.hbm [shape: f32[32,128], index: 0, kind: input, shape index: {}]   ;;  %s2677_s1 = inlined_call_operand.hbm [shape: f32[128,128], index: 1, kind: input, shape index: {}]   ;;  %s2678_s2 = inlined_call_operand.vmem [shape: f32[1,128], index: 2, kind: input, shape index: {}]   ;;  %s2679_s3 = inlined_call_operand.hbm [shape: f32[8,128,128], index: 3, kind: input, shape index: {}]   ;;  %s2680_s4 = inlined_call_operand.vmem [shape: f32[8,1,128], index: 4, kind: input, shape index: {}]   ;;  %s2681_s5 = inlined_call_operand.hbm [shape: f32[128,128], index: 5, kind: input, shape index: {}]   ;;  %s2682_s6 = inlined_call_operand.hbm [shape: f32[32,128], index: 6, kind: output, shape index: {}]  }
   0x1   :  { %12 = vsyncpa [#allocation6], 0 }
   0x2   :  { %13 = vsyncpa [#allocation9], 0 }
   0x3   :  { %14 = vsyncpa [#allocation4], 0  ;;  %s2406_s21 = smov [#allocation5]   ;;  %s2407_s23 = smov [#allocation2]  }
   0x4   :  { %s32_s22 = sshll.u32 %s2406_s21, 4  ;;  %s20_s24 = sshll.u32 %s2407_s23, 4  ;;  %s33_s22 = int_to_ptr.vmem [resolvable:$true] %s32_s22  ;;  %s2448_s24 = int_to_ptr.vmem [resolvable:$true] %s20_s24 }
   0x5   :  { %s2288_s27 = scalar_lea.hbm %s2677_s1, 2048 }
   0x6   :  { %p2289_p0 = scmp.ne.s32.totalorder %s2677_s1, %s2288_s27  ;;  %p2292_p1 = scmp.lt.u32.totalorder %s2288_s27, %s2677_s1 }
   0x8   :  { %p2294_p2 = pnand %p2292_p1, %p2289_p0 }
   0xa   :  { %2297 = shalt.err (!%p2294_p2)
}
   0xb   :  { %s2298_s8 = scalar_lea.vmem %s33_s22, 2048  ;;  %p2303_p4 = scmp.lt.s32.totalorder %s33_s22, %s33_s22 }
   0xc   :  { %p2299_p3 = scmp.ne.s32.totalorder %s33_s22, %s2298_s8  ;;  %p2304_p5 = scmp.lt.s32.totalorder %s2298_s8, %s2298_s8 }
   0xe   :  { %p2305_p6 = por %p2304_p5, %p2303_p4 }
  0x10   :  { %p2306_p7 = pnand %p2305_p6, %p2299_p3 }
  0x12   :  { %2309 = shalt.err (!%p2306_p7)
}
  0x13   :  { %s2408_s9 = smov 128   ;;  %s2409_s10 = smov 8  }
  0x14   :  { %38 = dma.hbm_to_vmem [thread:$0]  %s2677_s1, 2048, %s33_s22, [#allocation6], %s2408_s9, %s2408_s9, %s2409_s10  }
  0x15   :  { %s2310_s15 = scalar_lea.hbm %s2676_s0, 512 }
  0x16   :  { %p2311_p8 = scmp.ne.s32.totalorder %s2676_s0, %s2310_s15  ;;  %p2314_p9 = scmp.lt.u32.totalorder %s2310_s15, %s2676_s0 }
  0x18   :  { %p2316_p10 = pnand %p2314_p9, %p2311_p8 }
  0x1a   :  { %2319 = shalt.err (!%p2316_p10)
}
  0x1b   :  { %s2320_s20 = scalar_lea.vmem %s2448_s24, 512  ;;  %p2325_p12 = scmp.lt.s32.totalorder %s2448_s24, %s2448_s24 }
  0x1c   :  { %p2321_p11 = scmp.ne.s32.totalorder %s2448_s24, %s2320_s20  ;;  %p2326_p13 = scmp.lt.s32.totalorder %s2320_s20, %s2320_s20 }
  0x1e   :  { %p2327_p0 = por %p2326_p13, %p2325_p12 }
  0x20   :  { %p2328_p1 = pnand %p2327_p0, %p2321_p11 }
  0x22   :  { %2331 = shalt.err (!%p2328_p1)
}
  0x23   :  { %26 = dma.hbm_to_vmem [thread:$0]  %s2676_s0, 512, %s2448_s24, [#allocation3], %s2408_s9, %s2408_s9, %s2409_s10  }
  0x24   :  { %s2410_s22 = smov [#allocation7]   ;;  %s2411_s25 = smov [#allocation8]  }
  0x25   :  { %s46_s23 = sshll.u32 %s2410_s22, 4  ;;  %s60_s26 = sshll.u32 %s2411_s25, 4  ;;  %s47_s23 = int_to_ptr.vmem [resolvable:$true] %s46_s23  ;;  %s2485_s26 = int_to_ptr.vmem [resolvable:$true] %s60_s26 }
  0x26   :  { %s2332_s29 = scalar_lea.hbm %s2679_s3, 16384 }
  0x27   :  { %p2333_p2 = scmp.ne.s32.totalorder %s2679_s3, %s2332_s29  ;;  %p2336_p3 = scmp.lt.u32.totalorder %s2332_s29, %s2679_s3 }
  0x29   :  { %p2338_p4 = pnand %p2336_p3, %p2333_p2 }
  0x2b   :  { %2341 = shalt.err (!%p2338_p4)
}
  0x2c   :  { %s2342_s0 = scalar_lea.vmem %s47_s23, 16384  ;;  %p2347_p6 = scmp.lt.s32.totalorder %s47_s23, %s47_s23 }
  0x2d   :  { %p2343_p5 = scmp.ne.s32.totalorder %s47_s23, %s2342_s0  ;;  %p2348_p7 = scmp.lt.s32.totalorder %s2342_s0, %s2342_s0 }
  0x2f   :  { %p2349_p8 = por %p2348_p7, %p2347_p6 }
  0x31   :  { %p2350_p9 = pnand %p2349_p8, %p2343_p5 }
  0x33   :  { %2353 = shalt.err (!%p2350_p9)
}
  0x34   :  { %52 = dma.hbm_to_vmem [thread:$0]  %s2679_s3, 16384, %s47_s23, [#allocation6], %s2408_s9, %s2408_s9, %s2409_s10  }
  0x35   :  { %s2354_s15 = scalar_lea.hbm %s2681_s5, 2048 }
  0x36   :  { %p2355_p10 = scmp.ne.s32.totalorder %s2681_s5, %s2354_s15  ;;  %p2358_p11 = scmp.lt.u32.totalorder %s2354_s15, %s2681_s5 }
  0x38   :  { %p2360_p12 = pnand %p2358_p11, %p2355_p10 }
  0x3a   :  { %2363 = shalt.err (!%p2360_p12)
}
  0x3b   :  { %s2364_s20 = scalar_lea.vmem %s2485_s26, 2048  ;;  %p2369_p0 = scmp.lt.s32.totalorder %s2485_s26, %s2485_s26 }
  0x3c   :  { %p2365_p13 = scmp.ne.s32.totalorder %s2485_s26, %s2364_s20  ;;  %p2370_p1 = scmp.lt.s32.totalorder %s2364_s20, %s2364_s20 }
  0x3e   :  { %p2371_p2 = por %p2370_p1, %p2369_p0 }
  0x40   :  { %p2372_p3 = pnand %p2371_p2, %p2365_p13 }
  0x42   :  { %2375 = shalt.err (!%p2372_p3)
}
  0x43   :  { %66 = dma.hbm_to_vmem [thread:$0]  %s2681_s5, 2048, %s2485_s26, [#allocation9], %s2408_s9, %s2408_s9, %s2409_s10  }
  0x44   :  { %2398 = dma.done.wait [#allocation3], 512  }
  0x45   :  { %2399 = vsyncadd [#allocation3], 4294966784 }
  0x46   :  { %2400 = dma.done.wait [#allocation6], 18432  }
  0x47   :  { %2401 = vsyncadd [#allocation6], 4294948864 }
  0x48   :  { %2402 = dma.done.wait [#allocation9], 2048  }
  0x49   :  { %2403 = vsyncadd [#allocation9], 4294965248  ;;  %v83_v0 = vld [vmem:[#allocation5] sm:$0xff]  ;;  %v84_v1 = vld [vmem:[#allocation5 + $0x8] sm:$0xff] }
  0x4a   :  { %v85_v2 = vld [vmem:[#allocation5 + $0x10] sm:$0xff]  ;;  %v1889_v3 = vpack.c.bf16 %v84_v1, %v83_v0  ;;  %v86_v4 = vld [vmem:[#allocation5 + $0x18] sm:$0xff]  ;;  %v87_v6 = vld [vmem:[#allocation5 + $0x20] sm:$0xff] }
  0x4b   :  { %v1893_v5 = vpack.c.bf16 %v86_v4, %v85_v2  ;;  %v88_v7 = vld [vmem:[#allocation5 + $0x28] sm:$0xff]  ;;  %v79_v9 = vld [vmem:[#allocation2] sm:$0xff]  ;;  %v89_v10 = vld [vmem:[#allocation5 + $0x30] sm:$0xff] }
  0x4c   :  { %1890 = vmatprep.subr.bf16.mxu0 %v1889_v3  ;;  %v1897_v8 = vpack.c.bf16 %v88_v7, %v87_v6  ;;  %v90_v11 = vld [vmem:[#allocation5 + $0x38] sm:$0xff]  ;;  %1541 = vmatprep.mubr.f32.mxu0 %v79_v9  ;;  %v195_v12 = vld [vmem:[#allocation7] sm:$0xff]  ;;  %v196_v13 = vld [vmem:[#allocation7 + $0x8] sm:$0xff] }
  0x4d   :  { %1892 = vmatpush3.bf16.msra.mxu0 %v1889_v3  ;;  %v197_v14 = vld [vmem:[#allocation7 + $0x10] sm:$0xff]  ;;  %v198_v15 = vld [vmem:[#allocation7 + $0x18] sm:$0xff]  ;;  %v1921_v16 = vpack.c.bf16 %v196_v13, %v195_v12  ;;  %v1901_v18 = vpack.c.bf16 %v90_v11, %v89_v10  ;;  %v199_v19 = vld [vmem:[#allocation7 + $0x20] sm:$0xff] }
  0x4e   :  { %1894 = vmatprep.subr.bf16.mxu0 %v1893_v5  ;;  %v1925_v17 = vpack.c.bf16 %v198_v15, %v197_v14  ;;  %v200_v20 = vld [vmem:[#allocation7 + $0x28] sm:$0xff]  ;;  %v91_v21 = vld [vmem:[#allocation5 + $0x40] sm:$0xff]  ;;  %v201_v25 = vld [vmem:[#allocation7 + $0x30] sm:$0xff] }
  0x4f   :  { %v92_v22 = vld [vmem:[#allocation5 + $0x48] sm:$0xff]  ;;  %1922 = vmatprep.subr.bf16.mxu1 %v1921_v16  ;;  %v1929_v23 = vpack.c.bf16 %v200_v20, %v199_v19  ;;  %v202_v26 = vld [vmem:[#allocation7 + $0x38] sm:$0xff]  ;;  %v93_v27 = vld [vmem:[#allocation5 + $0x50] sm:$0xff] }
  0x50   :  { %1924 = vmatpush3.bf16.msra.mxu1 %v1921_v16  ;;  %v1905_v24 = vpack.c.bf16 %v92_v22, %v91_v21  ;;  %v94_v28 = vld [vmem:[#allocation5 + $0x58] sm:$0xff]  ;;  %v1933_v29 = vpack.c.bf16 %v202_v26, %v201_v25  ;;  %v95_v31 = vld [vmem:[#allocation5 + $0x60] sm:$0xff]  ;;  %v96_v32 = vld [vmem:[#allocation5 + $0x68] sm:$0xff] }
  0x51   :  { %1896 = vmatpush3.bf16.msra.mxu0 %v1893_v5  ;;  %1926 = vmatprep.subr.bf16.mxu1 %v1925_v17  ;;  %v1909_v30 = vpack.c.bf16 %v94_v28, %v93_v27  ;;  %v1913_v33 = vpack.c.bf16 %v96_v32, %v95_v31  ;;  %v97_v34 = vld [vmem:[#allocation5 + $0x70] sm:$0xff]  ;;  %v98_v35 = vld [vmem:[#allocation5 + $0x78] sm:$0xff]  ;;  %v80_v37 = vld [vmem:[#allocation2 + $0x8] sm:$0xff] }
  0x52   :  { %1898 = vmatprep.subr.bf16.mxu0 %v1897_v8  ;;  %v1917_v36 = vpack.c.bf16 %v98_v35, %v97_v34  ;;  %v81_v38 = vld [vmem:[#allocation2 + $0x10] sm:$0xff]  ;;  %v82_v39 = vld [vmem:[#allocation2 + $0x18] sm:$0xff]  ;;  %v203_v40 = vld [vmem:[#allocation7 + $0x40] sm:$0xff] }
  0x53   :  { %v204_v41 = vld [vmem:[#allocation7 + $0x48] sm:$0xff]  ;;  %v205_v43 = vld [vmem:[#allocation7 + $0x50] sm:$0xff]  ;;  %v206_v44 = vld [vmem:[#allocation7 + $0x58] sm:$0xff] }
  0x54   :  { %1928 = vmatpush3.bf16.msra.mxu1 %v1925_v17  ;;  %v1937_v42 = vpack.c.bf16 %v204_v41, %v203_v40  ;;  %v1941_v45 = vpack.c.bf16 %v206_v44, %v205_v43  ;;  %v207_v46 = vld [vmem:[#allocation7 + $0x60] sm:$0xff]  ;;  %v208_v47 = vld [vmem:[#allocation7 + $0x68] sm:$0xff]  ;;  %v209_v49 = vld [vmem:[#allocation7 + $0x70] sm:$0xff] }
  0x55   :  { %1900 = vmatpush3.bf16.msra.mxu0 %v1897_v8  ;;  %1930 = vmatprep.subr.bf16.mxu1 %v1929_v23  ;;  %v1945_v48 = vpack.c.bf16 %v208_v47, %v207_v46  ;;  %v210_v50 = vld [vmem:[#allocation7 + $0x78] sm:$0xff]  ;;  %v316_v52 = vld [vmem:[#allocation7 + $0x80] sm:$0xff]  ;;  %v317_v53 = vld [vmem:[#allocation7 + $0x88] sm:$0xff] }
  0x56   :  { %1902 = vmatprep.subr.bf16.mxu0 %v1901_v18  ;;  %v1949_v51 = vpack.c.bf16 %v210_v50, %v209_v49  ;;  %v318_v54 = vld [vmem:[#allocation7 + $0x90] sm:$0xff]  ;;  %v1953_v55 = vpack.c.bf16 %v317_v53, %v316_v52  ;;  %v319_v56 = vld [vmem:[#allocation7 + $0x98] sm:$0xff]  ;;  %v320_v58 = vld [vmem:[#allocation7 + $0xa0] sm:$0xff] }
  0x57   :  { %v1957_v57 = vpack.c.bf16 %v319_v56, %v318_v54  ;;  %v321_v59 = vld [vmem:[#allocation7 + $0xa8] sm:$0xff]  ;;  %v1293_v61 = vld [vmem:[%s2678_s2] ss:$0 sm:$0xff]  ;;  %v322_v10 = vld [vmem:[#allocation7 + $0xb0] sm:$0xff] }
  0x58   :  { %1932 = vmatpush3.bf16.msra.mxu1 %v1929_v23  ;;  %v1961_v60 = vpack.c.bf16 %v321_v59, %v320_v58  ;;  %v323_v11 = vld [vmem:[#allocation7 + $0xb8] sm:$0xff]  ;;  %v324_v13 = vld [vmem:[#allocation7 + $0xc0] sm:$0xff]  ;;  %v325_v14 = vld [vmem:[#allocation7 + $0xc8] sm:$0xff] }
  0x59   :  { %1904 = vmatpush3.bf16.msra.mxu0 %v1901_v18  ;;  %1934 = vmatprep.subr.bf16.mxu1 %v1933_v29  ;;  %v1965_v12 = vpack.c.bf16 %v323_v11, %v322_v10  ;;  %v1969_v15 = vpack.c.bf16 %v325_v14, %v324_v13  ;;  %v326_v16 = vld [vmem:[#allocation7 + $0xd0] sm:$0xff]  ;;  %v327_v17 = vld [vmem:[#allocation7 + $0xd8] sm:$0xff]  ;;  %v328_v19 = vld [vmem:[#allocation7 + $0xe0] sm:$0xff] }
  0x5a   :  { %1906 = vmatprep.subr.bf16.mxu0 %v1905_v24  ;;  %v1973_v18 = vpack.c.bf16 %v327_v17, %v326_v16  ;;  %v329_v20 = vld [vmem:[#allocation7 + $0xe8] sm:$0xff]  ;;  %v330_v22 = vld [vmem:[#allocation7 + $0xf0] sm:$0xff]  ;;  %v331_v23 = vld [vmem:[#allocation7 + $0xf8] sm:$0xff] }
  0x5b   :  { %v1977_v21 = vpack.c.bf16 %v329_v20, %v328_v19  ;;  %v438_v25 = vld [vmem:[#allocation7 + $0x100] sm:$0xff]  ;;  %v439_v26 = vld [vmem:[#allocation7 + $0x108] sm:$0xff]  ;;  %v440_v27 = vld [vmem:[#allocation7 + $0x110] sm:$0xff] }
  0x5c   :  { %1936 = vmatpush3.bf16.msra.mxu1 %v1933_v29  ;;  %v1985_v28 = vpack.c.bf16 %v439_v26, %v438_v25  ;;  %v441_v29 = vld [vmem:[#allocation7 + $0x118] sm:$0xff]  ;;  %v442_v31 = vld [vmem:[#allocation7 + $0x120] sm:$0xff]  ;;  %v443_v32 = vld [vmem:[#allocation7 + $0x128] sm:$0xff] }
  0x5d   :  { %1908 = vmatpush3.bf16.msra.mxu0 %v1905_v24  ;;  %1938 = vmatprep.subr.bf16.mxu1 %v1937_v42  ;;  %v1981_v24 = vpack.c.bf16 %v331_v23, %v330_v22  ;;  %v1294_v34 = vld [vmem:[%s2680_s4] ss:$0 sm:$0xff]  ;;  %v445_v56 = vld [vmem:[#allocation7 + $0x138] sm:$0xff]  ;;  %v447_v59 = vld [vmem:[#allocation7 + $0x148] sm:$0xff] }
  0x5e   :  { %1910 = vmatprep.subr.bf16.mxu0 %v1909_v30  ;;  %v446_v58 = vld [vmem:[#allocation7 + $0x140] sm:$0xff]  ;;  %v563_v10 = vld [vmem:[#allocation7 + $0x198] sm:$0xff]  ;;  %v565_v13 = vld [vmem:[#allocation7 + $0x1a8] sm:$0xff] }
  0x60   :  { %1940 = vmatpush3.bf16.msra.mxu1 %v1937_v42 }
  0x61   :  { %1912 = vmatpush3.bf16.msra.mxu0 %v1909_v30  ;;  %1942 = vmatprep.subr.bf16.mxu1 %v1941_v45  ;;  %v1989_v30 = vpack.c.bf16 %v441_v29, %v440_v27 }
  0x62   :  { %1914 = vmatprep.subr.bf16.mxu0 %v1913_v33 }
  0x64   :  { %1944 = vmatpush3.bf16.msra.mxu1 %v1941_v45 }
  0x65   :  { %1916 = vmatpush3.bf16.msra.mxu0 %v1913_v33  ;;  %1946 = vmatprep.subr.bf16.mxu1 %v1945_v48  ;;  %v1993_v33 = vpack.c.bf16 %v443_v32, %v442_v31 }
  0x66   :  { %1918 = vmatprep.subr.bf16.mxu0 %v1917_v36 }
  0x68   :  { %1948 = vmatpush3.bf16.msra.mxu1 %v1945_v48 }
  0x69   :  { %1920 = vmatpush3.bf16.msra.mxu0 %v1917_v36  ;;  %1950 = vmatprep.subr.bf16.mxu1 %v1949_v51 }
  0x6a   :  { %1954 = vmatprep.subr.bf16.mxu0 %v1953_v55 }
  0x6c   :  { %1542 = vmatmul.mubr.f32.vlgmr.msra.gmra.mrb[0].mxu0 %v80_v37  ;;  %1952 = vmatpush3.bf16.msra.mxu1 %v1949_v51 }
  0x6d   :  { %1544 = vmatprep.mubr.f32.mxu0 %v81_v38  ;;  %1956 = vmatpush3.bf16.msra.mxu0 %v1953_v55  ;;  %v444_v55 = vld [vmem:[#allocation7 + $0x130] sm:$0xff] }
  0x6e   :  { %1958 = vmatprep.subr.bf16.mxu0 %v1957_v57  ;;  %1986 = vmatprep.subr.bf16.mxu1 %v1985_v28 }
  0x70   :  { %1545 = vmatmul.mubr.f32.gmra.mrb[2].mxu0 %v82_v39 }
  0x71   :  { %1960 = vmatpush3.bf16.msra.mxu0 %v1957_v57  ;;  %v1997_v57 = vpack.c.bf16 %v445_v56, %v444_v55  ;;  %v685_v55 = vld [vmem:[#allocation7 + $0x218] sm:$0xff] }
  0x72   :  { %1962 = vmatprep.subr.bf16.mxu0 %v1961_v60 }
  0x75   :  { %1964 = vmatpush3.bf16.msra.mxu0 %v1961_v60  ;;  %v2001_v60 = vpack.c.bf16 %v447_v59, %v446_v58  ;;  %v687_v58 = vld [vmem:[#allocation7 + $0x228] sm:$0xff] }
  0x76   :  { %1966 = vmatprep.subr.bf16.mxu0 %v1965_v12 }
  0x79   :  { %1968 = vmatpush3.bf16.msra.mxu0 %v1965_v12  ;;  %v564_v12 = vld [vmem:[#allocation7 + $0x1a0] sm:$0xff] }
  0x7a   :  { %1970 = vmatprep.subr.bf16.mxu0 %v1969_v15  ;;  %v2025_v14 = vpack.c.bf16 %v565_v13, %v564_v12 }
  0x7d   :  { %1972 = vmatpush3.bf16.msra.mxu0 %v1969_v15  ;;  %v1296_v15 = vld [vmem:[%s2680_s4 + $0x1] ss:$0 sm:$0xff] }
  0x7e   :  { %1974 = vmatprep.subr.bf16.mxu0 %v1973_v18 }
  0x81   :  { %1976 = vmatpush3.bf16.msra.mxu0 %v1973_v18 }
  0x82   :  { %1978 = vmatprep.subr.bf16.mxu0 %v1977_v21 }
  0x85   :  { %1980 = vmatpush3.bf16.msra.mxu0 %v1977_v21 }
  0x86   :  { %1982 = vmatprep.subr.bf16.mxu0 %v1981_v24 }
  0x89   :  { %1984 = vmatpush3.bf16.msra.mxu0 %v1981_v24 }
 0x13f   :  { %v1543_v62 = vpop.f32.mrb[0].mxu0 }
 0x140   :  { %v178_v63 = vadd.f32 %v1543_v62, %v1293_v61  ;;  %v172_v0 = vpop.f32.mrb[1].mxu0  ;;  %v449_v62 = vld [vmem:[#allocation7 + $0x158] sm:$0xff] }
 0x141   :  { %v173_v1 = vadd.f32 %v1293_v61, %v172_v0  ;;  %v450_v0 = vld [vmem:[#allocation7 + $0x160] sm:$0xff] }
 0x143   :  { %2216 = vtanh.f32 %v173_v1  ;;  %v1546_v2 = vpop.f32.mrb[2].mxu0  ;;  %v451_v1 = vld [vmem:[#allocation7 + $0x168] sm:$0xff] }
 0x144   :  { %2218 = vtanh.f32 %v178_v63  ;;  %v188_v3 = vadd.f32 %v1546_v2, %v1293_v61  ;;  %v182_v4 = vpop.f32.mrb[3].mxu0  ;;  %v2009_v2 = vpack.c.bf16 %v451_v1, %v450_v0 }
 0x145   :  { %v183_v5 = vadd.f32 %v1293_v61, %v182_v4  ;;  %v448_v61 = vld [vmem:[#allocation7 + $0x150] sm:$0xff]  ;;  %v453_v4 = vld [vmem:[#allocation7 + $0x178] sm:$0xff] }
 0x146   :  { %v2005_v63 = vpack.c.bf16 %v449_v62, %v448_v61 }
 0x147   :  { %2220 = vtanh.f32 %v183_v5 }
 0x148   :  { %2222 = vtanh.f32 %v188_v3  ;;  %v452_v3 = vld [vmem:[#allocation7 + $0x170] sm:$0xff] }
 0x149   :  { %v2013_v5 = vpack.c.bf16 %v453_v4, %v452_v3 }
 0x14d   :  { %v2525_v6 = vpop.eup %2216 }
 0x14e   :  { %v2527_v7 = vpop.eup %2218  ;;  %1579 = vmatprep.mubr.f32.mxu1 %v2525_v6 }
 0x14f   :  { %1580 = vmatmul.mubr.f32.vlgmr.msra.gmra.mrb[0].mxu1 %v2527_v7 }
 0x150   :  { %1988 = vmatpush3.bf16.msra.mxu1 %v1985_v28 }
 0x151   :  { %v2531_v8 = vpop.eup %2220  ;;  %1990 = vmatprep.subr.bf16.mxu1 %v1989_v30 }
 0x152   :  { %v2533_v9 = vpop.eup %2222  ;;  %1582 = vmatprep.mubr.f32.mxu1 %v2531_v8 }
 0x153   :  { %1583 = vmatmul.mubr.f32.gmra.mrb[2].mxu1 %v2533_v9 }
 0x154   :  { %1992 = vmatpush3.bf16.msra.mxu1 %v1989_v30 }
 0x155   :  { %1994 = vmatprep.subr.bf16.mxu1 %v1993_v33 }
 0x158   :  { %1996 = vmatpush3.bf16.msra.mxu1 %v1993_v33 }
 0x159   :  { %1998 = vmatprep.subr.bf16.mxu1 %v1997_v57 }
 0x15c   :  { %2000 = vmatpush3.bf16.msra.mxu1 %v1997_v57  ;;  %v686_v57 = vld [vmem:[#allocation7 + $0x220] sm:$0xff] }
 0x15d   :  { %2002 = vmatprep.subr.bf16.mxu1 %v2001_v60  ;;  %v2057_v59 = vpack.c.bf16 %v687_v58, %v686_v57 }
 0x160   :  { %2004 = vmatpush3.bf16.msra.mxu1 %v2001_v60  ;;  %v1298_v60 = vld [vmem:[%s2680_s4 + $0x2] ss:$0 sm:$0xff] }
 0x161   :  { %2006 = vmatprep.subr.bf16.mxu1 %v2005_v63 }
 0x164   :  { %2008 = vmatpush3.bf16.msra.mxu1 %v2005_v63 }
 0x165   :  { %2010 = vmatprep.subr.bf16.mxu1 %v2009_v2 }
 0x168   :  { %2012 = vmatpush3.bf16.msra.mxu1 %v2009_v2 }
 0x169   :  { %2014 = vmatprep.subr.bf16.mxu1 %v2013_v5 }
 0x16c   :  { %2016 = vmatpush3.bf16.msra.mxu1 %v2013_v5 }
 0x222   :  { %v1581_v35 = vpop.f32.mrb[0].mxu1 }
 0x223   :  { %v290_v36 = vadd.f32 %v1581_v35, %v1294_v34  ;;  %v284_v37 = vpop.f32.mrb[1].mxu1 }
 0x224   :  { %v285_v38 = vadd.f32 %v1294_v34, %v284_v37  ;;  %v567_v37 = vld [vmem:[#allocation7 + $0x1b8] sm:$0xff] }
 0x225   :  { %2224 = vtanh.f32 %v290_v36  ;;  %v566_v36 = vld [vmem:[#allocation7 + $0x1b0] sm:$0xff] }
 0x226   :  { %2226 = vtanh.f32 %v285_v38  ;;  %v1584_v39 = vpop.f32.mrb[2].mxu1  ;;  %v2029_v38 = vpack.c.bf16 %v567_v37, %v566_v36  ;;  %v807_v36 = vld [vmem:[#allocation7 + $0x298] sm:$0xff] }
 0x227   :  { %v300_v40 = vadd.f32 %v1584_v39, %v1294_v34  ;;  %v294_v41 = vpop.f32.mrb[3].mxu1  ;;  %v568_v39 = vld [vmem:[#allocation7 + $0x1c0] sm:$0xff] }
 0x228   :  { %v295_v42 = vadd.f32 %v1294_v34, %v294_v41 }
 0x229   :  { %2228 = vtanh.f32 %v300_v40  ;;  %v569_v40 = vld [vmem:[#allocation7 + $0x1c8] sm:$0xff] }
 0x22a   :  { %2230 = vtanh.f32 %v295_v42  ;;  %v2033_v41 = vpack.c.bf16 %v569_v40, %v568_v39  ;;  %v570_v42 = vld [vmem:[#allocation7 + $0x1d0] sm:$0xff]  ;;  %v809_v39 = vld [vmem:[#allocation7 + $0x2a8] sm:$0xff] }
 0x22f   :  { %v2225_v43 = vpop.eup %2224 }
 0x230   :  { %v2227_v44 = vpop.eup %2226  ;;  %v308_v45 = vmul.f32 0.125, %v2225_v43  ;;  %v571_v43 = vld [vmem:[#allocation7 + $0x1d8] sm:$0xff] }
 0x231   :  { %v307_v46 = vmul.f32 0.125, %v2227_v44  ;;  %v2037_v44 = vpack.c.bf16 %v571_v43, %v570_v42 }
 0x232   :  { %v2544_v50 = vadd.f32 %v2527_v7, %v308_v45  ;;  %v561_v7 = vld [vmem:[#allocation7 + $0x188] sm:$0xff]  ;;  %v572_v45 = vld [vmem:[#allocation7 + $0x1e0] sm:$0xff] }
 0x233   :  { %v2229_v47 = vpop.eup %2228  ;;  %v2541_v48 = vadd.f32 %v2525_v6, %v307_v46  ;;  %v560_v6 = vld [vmem:[#allocation7 + $0x180] sm:$0xff]  ;;  %v573_v46 = vld [vmem:[#allocation7 + $0x1e8] sm:$0xff] }
 0x234   :  { %v2231_v49 = vpop.eup %2230  ;;  %v310_v51 = vmul.f32 0.125, %v2229_v47  ;;  %v2041_v47 = vpack.c.bf16 %v573_v46, %v572_v45 }
 0x235   :  { %v309_v52 = vmul.f32 0.125, %v2231_v49  ;;  %1617 = vmatprep.mubr.f32.mxu0 %v2541_v48  ;;  %v575_v49 = vld [vmem:[#allocation7 + $0x1f8] sm:$0xff] }
 0x236   :  { %1618 = vmatmul.mubr.f32.vlgmr.msra.gmra.mrb[4].mxu0 %v2544_v50  ;;  %v2552_v54 = vadd.f32 %v2533_v9, %v310_v51  ;;  %v2017_v9 = vpack.c.bf16 %v561_v7, %v560_v6  ;;  %v682_v51 = vld [vmem:[#allocation7 + $0x200] sm:$0xff] }
 0x237   :  { %v2549_v53 = vadd.f32 %v2531_v8, %v309_v52  ;;  %v562_v8 = vld [vmem:[#allocation7 + $0x190] sm:$0xff]  ;;  %v683_v52 = vld [vmem:[#allocation7 + $0x208] sm:$0xff] }
 0x238   :  { %v2021_v11 = vpack.c.bf16 %v563_v10, %v562_v8  ;;  %2018 = vmatprep.subr.bf16.mxu0 %v2017_v9 }
 0x239   :  { %1620 = vmatprep.mubr.f32.mxu0 %v2549_v53  ;;  %2020 = vmatpush3.bf16.msra.mxu0 %v2017_v9 }
 0x23a   :  { %1621 = vmatmul.mubr.f32.gmra.mrb[6].mxu0 %v2552_v54  ;;  %2022 = vmatprep.subr.bf16.mxu0 %v2021_v11 }
 0x23d   :  { %2024 = vmatpush3.bf16.msra.mxu0 %v2021_v11 }
 0x23e   :  { %2026 = vmatprep.subr.bf16.mxu0 %v2025_v14 }
 0x241   :  { %2028 = vmatpush3.bf16.msra.mxu0 %v2025_v14 }
 0x242   :  { %2030 = vmatprep.subr.bf16.mxu0 %v2029_v38 }
 0x245   :  { %2032 = vmatpush3.bf16.msra.mxu0 %v2029_v38  ;;  %v808_v38 = vld [vmem:[#allocation7 + $0x2a0] sm:$0xff] }
 0x246   :  { %2034 = vmatprep.subr.bf16.mxu0 %v2033_v41  ;;  %v2089_v40 = vpack.c.bf16 %v809_v39, %v808_v38 }
 0x249   :  { %2036 = vmatpush3.bf16.msra.mxu0 %v2033_v41  ;;  %v1300_v41 = vld [vmem:[%s2680_s4 + $0x3] ss:$0 sm:$0xff] }
 0x24a   :  { %2038 = vmatprep.subr.bf16.mxu0 %v2037_v44 }
 0x24d   :  { %2040 = vmatpush3.bf16.msra.mxu0 %v2037_v44 }
 0x24e   :  { %2042 = vmatprep.subr.bf16.mxu0 %v2041_v47 }
 0x251   :  { %2044 = vmatpush3.bf16.msra.mxu0 %v2041_v47 }
 0x309   :  { %v1619_v16 = vpop.f32.mrb[4].mxu0 }
 0x30a   :  { %v412_v17 = vadd.f32 %v1619_v16, %v1296_v15  ;;  %v406_v18 = vpop.f32.mrb[5].mxu0 }
 0x30b   :  { %v407_v19 = vadd.f32 %v1296_v15, %v406_v18  ;;  %v689_v18 = vld [vmem:[#allocation7 + $0x238] sm:$0xff] }
 0x30c   :  { %2232 = vtanh.f32 %v412_v17  ;;  %v688_v17 = vld [vmem:[#allocation7 + $0x230] sm:$0xff] }
 0x30d   :  { %2234 = vtanh.f32 %v407_v19  ;;  %v1622_v20 = vpop.f32.mrb[6].mxu0  ;;  %v2061_v19 = vpack.c.bf16 %v689_v18, %v688_v17  ;;  %v929_v17 = vld [vmem:[#allocation7 + $0x318] sm:$0xff] }
 0x30e   :  { %v422_v21 = vadd.f32 %v1622_v20, %v1296_v15  ;;  %v416_v22 = vpop.f32.mrb[7].mxu0  ;;  %v690_v20 = vld [vmem:[#allocation7 + $0x240] sm:$0xff] }
 0x30f   :  { %v417_v23 = vadd.f32 %v1296_v15, %v416_v22 }
 0x310   :  { %2236 = vtanh.f32 %v422_v21  ;;  %v691_v21 = vld [vmem:[#allocation7 + $0x248] sm:$0xff] }
 0x311   :  { %2238 = vtanh.f32 %v417_v23  ;;  %v2065_v22 = vpack.c.bf16 %v691_v21, %v690_v20  ;;  %v692_v23 = vld [vmem:[#allocation7 + $0x250] sm:$0xff]  ;;  %v931_v20 = vld [vmem:[#allocation7 + $0x328] sm:$0xff] }
 0x316   :  { %v2233_v24 = vpop.eup %2232 }
 0x317   :  { %v2235_v25 = vpop.eup %2234  ;;  %v430_v26 = vmul.f32 0.125, %v2233_v24  ;;  %v693_v24 = vld [vmem:[#allocation7 + $0x258] sm:$0xff] }
 0x318   :  { %v429_v27 = vmul.f32 0.125, %v2235_v25  ;;  %v2069_v25 = vpack.c.bf16 %v693_v24, %v692_v23 }
 0x319   :  { %v2563_v31 = vadd.f32 %v430_v26, %v2544_v50  ;;  %v694_v26 = vld [vmem:[#allocation7 + $0x260] sm:$0xff] }
 0x31a   :  { %v2237_v28 = vpop.eup %2236  ;;  %v2560_v29 = vadd.f32 %v429_v27, %v2541_v48  ;;  %v574_v48 = vld [vmem:[#allocation7 + $0x1f0] sm:$0xff]  ;;  %v695_v27 = vld [vmem:[#allocation7 + $0x268] sm:$0xff] }
 0x31b   :  { %v2239_v30 = vpop.eup %2238  ;;  %v432_v32 = vmul.f32 0.125, %v2237_v28  ;;  %v2045_v50 = vpack.c.bf16 %v575_v49, %v574_v48  ;;  %v2073_v28 = vpack.c.bf16 %v695_v27, %v694_v26 }
 0x31c   :  { %v431_v33 = vmul.f32 0.125, %v2239_v30  ;;  %1655 = vmatprep.mubr.f32.mxu1 %v2560_v29  ;;  %v697_v30 = vld [vmem:[#allocation7 + $0x278] sm:$0xff] }
 0x31d   :  { %1656 = vmatmul.mubr.f32.vlgmr.msra.gmra.mrb[4].mxu1 %v2563_v31  ;;  %v2571_v35 = vadd.f32 %v432_v32, %v2552_v54  ;;  %2046 = vmatprep.subr.bf16.mxu0 %v2045_v50  ;;  %v2049_v54 = vpack.c.bf16 %v683_v52, %v682_v51  ;;  %v804_v32 = vld [vmem:[#allocation7 + $0x280] sm:$0xff] }
 0x31e   :  { %v2568_v34 = vadd.f32 %v431_v33, %v2549_v53  ;;  %2048 = vmatpush3.bf16.msra.mxu0 %v2045_v50  ;;  %v684_v53 = vld [vmem:[#allocation7 + $0x210] sm:$0xff]  ;;  %v805_v33 = vld [vmem:[#allocation7 + $0x288] sm:$0xff] }
 0x31f   :  { %v2053_v56 = vpack.c.bf16 %v685_v55, %v684_v53  ;;  %2050 = vmatprep.subr.bf16.mxu1 %v2049_v54 }
 0x320   :  { %1658 = vmatprep.mubr.f32.mxu1 %v2568_v34  ;;  %2052 = vmatpush3.bf16.msra.mxu1 %v2049_v54 }
 0x321   :  { %1659 = vmatmul.mubr.f32.gmra.mrb[6].mxu1 %v2571_v35  ;;  %2054 = vmatprep.subr.bf16.mxu1 %v2053_v56 }
 0x324   :  { %2056 = vmatpush3.bf16.msra.mxu1 %v2053_v56 }
 0x325   :  { %2058 = vmatprep.subr.bf16.mxu1 %v2057_v59 }
 0x328   :  { %2060 = vmatpush3.bf16.msra.mxu1 %v2057_v59 }
 0x329   :  { %2062 = vmatprep.subr.bf16.mxu1 %v2061_v19 }
 0x32c   :  { %2064 = vmatpush3.bf16.msra.mxu1 %v2061_v19  ;;  %v930_v19 = vld [vmem:[#allocation7 + $0x320] sm:$0xff] }
 0x32d   :  { %2066 = vmatprep.subr.bf16.mxu1 %v2065_v22  ;;  %v2121_v21 = vpack.c.bf16 %v931_v20, %v930_v19 }
 0x330   :  { %2068 = vmatpush3.bf16.msra.mxu1 %v2065_v22  ;;  %v1302_v22 = vld [vmem:[%s2680_s4 + $0x4] ss:$0 sm:$0xff] }
 0x331   :  { %2070 = vmatprep.subr.bf16.mxu1 %v2069_v25 }
 0x334   :  { %2072 = vmatpush3.bf16.msra.mxu1 %v2069_v25 }
 0x335   :  { %2074 = vmatprep.subr.bf16.mxu1 %v2073_v28 }
 0x338   :  { %2076 = vmatpush3.bf16.msra.mxu1 %v2073_v28 }
 0x3f0   :  { %v1657_v61 = vpop.f32.mrb[4].mxu1 }
 0x3f1   :  { %v534_v62 = vadd.f32 %v1657_v61, %v1298_v60  ;;  %v528_v63 = vpop.f32.mrb[5].mxu1 }
 0x3f2   :  { %v529_v0 = vadd.f32 %v1298_v60, %v528_v63  ;;  %v811_v63 = vld [vmem:[#allocation7 + $0x2b8] sm:$0xff] }
 0x3f3   :  { %2240 = vtanh.f32 %v534_v62  ;;  %v810_v62 = vld [vmem:[#allocation7 + $0x2b0] sm:$0xff] }
 0x3f4   :  { %2242 = vtanh.f32 %v529_v0  ;;  %v1660_v1 = vpop.f32.mrb[6].mxu1  ;;  %v2093_v0 = vpack.c.bf16 %v811_v63, %v810_v62  ;;  %v1051_v62 = vld [vmem:[#allocation7 + $0x398] sm:$0xff] }
 0x3f5   :  { %v544_v2 = vadd.f32 %v1660_v1, %v1298_v60  ;;  %v538_v3 = vpop.f32.mrb[7].mxu1  ;;  %v812_v1 = vld [vmem:[#allocation7 + $0x2c0] sm:$0xff] }
 0x3f6   :  { %v539_v4 = vadd.f32 %v1298_v60, %v538_v3 }
 0x3f7   :  { %2244 = vtanh.f32 %v544_v2  ;;  %v813_v2 = vld [vmem:[#allocation7 + $0x2c8] sm:$0xff] }
 0x3f8   :  { %2246 = vtanh.f32 %v539_v4  ;;  %v2097_v3 = vpack.c.bf16 %v813_v2, %v812_v1  ;;  %v814_v4 = vld [vmem:[#allocation7 + $0x2d0] sm:$0xff]  ;;  %v1053_v1 = vld [vmem:[#allocation7 + $0x3a8] sm:$0xff] }
 0x3fd   :  { %v2241_v5 = vpop.eup %2240 }
 0x3fe   :  { %v2243_v6 = vpop.eup %2242  ;;  %v552_v7 = vmul.f32 0.125, %v2241_v5  ;;  %v815_v5 = vld [vmem:[#allocation7 + $0x2d8] sm:$0xff] }
 0x3ff   :  { %v551_v8 = vmul.f32 0.125, %v2243_v6  ;;  %v2101_v6 = vpack.c.bf16 %v815_v5, %v814_v4 }
 0x400   :  { %v2582_v12 = vadd.f32 %v552_v7, %v2563_v31  ;;  %v816_v7 = vld [vmem:[#allocation7 + $0x2e0] sm:$0xff] }
 0x401   :  { %v2245_v9 = vpop.eup %2244  ;;  %v2579_v10 = vadd.f32 %v551_v8, %v2560_v29  ;;  %v696_v29 = vld [vmem:[#allocation7 + $0x270] sm:$0xff]  ;;  %v817_v8 = vld [vmem:[#allocation7 + $0x2e8] sm:$0xff] }
 0x402   :  { %v2247_v11 = vpop.eup %2246  ;;  %v554_v13 = vmul.f32 0.125, %v2245_v9  ;;  %v2077_v31 = vpack.c.bf16 %v697_v30, %v696_v29  ;;  %v2105_v9 = vpack.c.bf16 %v817_v8, %v816_v7 }
 0x403   :  { %v553_v14 = vmul.f32 0.125, %v2247_v11  ;;  %1693 = vmatprep.mubr.f32.mxu0 %v2579_v10  ;;  %v819_v11 = vld [vmem:[#allocation7 + $0x2f8] sm:$0xff] }
 0x404   :  { %1694 = vmatmul.mubr.f32.vlgmr.msra.gmra.mrb[8].mxu0 %v2582_v12  ;;  %v2590_v16 = vadd.f32 %v554_v13, %v2571_v35  ;;  %2078 = vmatprep.subr.bf16.mxu1 %v2077_v31  ;;  %v2081_v35 = vpack.c.bf16 %v805_v33, %v804_v32  ;;  %v926_v13 = vld [vmem:[#allocation7 + $0x300] sm:$0xff] }
 0x405   :  { %v2587_v15 = vadd.f32 %v553_v14, %v2568_v34  ;;  %2080 = vmatpush3.bf16.msra.mxu1 %v2077_v31  ;;  %v806_v34 = vld [vmem:[#allocation7 + $0x290] sm:$0xff]  ;;  %v927_v14 = vld [vmem:[#allocation7 + $0x308] sm:$0xff] }
 0x406   :  { %v2085_v37 = vpack.c.bf16 %v807_v36, %v806_v34  ;;  %2082 = vmatprep.subr.bf16.mxu0 %v2081_v35 }
 0x407   :  { %1696 = vmatprep.mubr.f32.mxu0 %v2587_v15  ;;  %2084 = vmatpush3.bf16.msra.mxu0 %v2081_v35 }
 0x408   :  { %1697 = vmatmul.mubr.f32.gmra.mrb[10].mxu0 %v2590_v16  ;;  %2086 = vmatprep.subr.bf16.mxu0 %v2085_v37 }
 0x40b   :  { %2088 = vmatpush3.bf16.msra.mxu0 %v2085_v37 }
 0x40c   :  { %2090 = vmatprep.subr.bf16.mxu0 %v2089_v40 }
 0x40f   :  { %2092 = vmatpush3.bf16.msra.mxu0 %v2089_v40 }
 0x410   :  { %2094 = vmatprep.subr.bf16.mxu0 %v2093_v0 }
 0x413   :  { %2096 = vmatpush3.bf16.msra.mxu0 %v2093_v0  ;;  %v1052_v0 = vld [vmem:[#allocation7 + $0x3a0] sm:$0xff] }
 0x414   :  { %2098 = vmatprep.subr.bf16.mxu0 %v2097_v3  ;;  %v2153_v2 = vpack.c.bf16 %v1053_v1, %v1052_v0 }
 0x417   :  { %2100 = vmatpush3.bf16.msra.mxu0 %v2097_v3  ;;  %v1304_v3 = vld [vmem:[%s2680_s4 + $0x5] ss:$0 sm:$0xff] }
 0x418   :  { %2102 = vmatprep.subr.bf16.mxu0 %v2101_v6 }
 0x41b   :  { %2104 = vmatpush3.bf16.msra.mxu0 %v2101_v6 }
 0x41c   :  { %2106 = vmatprep.subr.bf16.mxu0 %v2105_v9 }
 0x41f   :  { %2108 = vmatpush3.bf16.msra.mxu0 %v2105_v9 }
 0x4d7   :  { %v1695_v42 = vpop.f32.mrb[8].mxu0 }
 0x4d8   :  { %v656_v43 = vadd.f32 %v1695_v42, %v1300_v41  ;;  %v650_v44 = vpop.f32.mrb[9].mxu0 }
 0x4d9   :  { %v651_v45 = vadd.f32 %v1300_v41, %v650_v44  ;;  %v933_v44 = vld [vmem:[#allocation7 + $0x338] sm:$0xff] }
 0x4da   :  { %2248 = vtanh.f32 %v656_v43  ;;  %v932_v43 = vld [vmem:[#allocation7 + $0x330] sm:$0xff] }
 0x4db   :  { %2250 = vtanh.f32 %v651_v45  ;;  %v1698_v46 = vpop.f32.mrb[10].mxu0  ;;  %v2125_v45 = vpack.c.bf16 %v933_v44, %v932_v43  ;;  %v1172_v43 = vld [vmem:[#allocation8 + $0x18] sm:$0xff] }
 0x4dc   :  { %v666_v47 = vadd.f32 %v1698_v46, %v1300_v41  ;;  %v660_v48 = vpop.f32.mrb[11].mxu0  ;;  %v934_v46 = vld [vmem:[#allocation7 + $0x340] sm:$0xff] }
 0x4dd   :  { %v661_v49 = vadd.f32 %v1300_v41, %v660_v48 }
 0x4de   :  { %2252 = vtanh.f32 %v666_v47  ;;  %v935_v47 = vld [vmem:[#allocation7 + $0x348] sm:$0xff] }
 0x4df   :  { %2254 = vtanh.f32 %v661_v49  ;;  %v2129_v48 = vpack.c.bf16 %v935_v47, %v934_v46  ;;  %v936_v49 = vld [vmem:[#allocation7 + $0x350] sm:$0xff]  ;;  %v1174_v46 = vld [vmem:[#allocation8 + $0x28] sm:$0xff] }
 0x4e4   :  { %v2249_v50 = vpop.eup %2248 }
 0x4e5   :  { %v2251_v51 = vpop.eup %2250  ;;  %v674_v52 = vmul.f32 0.125, %v2249_v50  ;;  %v937_v50 = vld [vmem:[#allocation7 + $0x358] sm:$0xff] }
 0x4e6   :  { %v673_v53 = vmul.f32 0.125, %v2251_v51  ;;  %v2133_v51 = vpack.c.bf16 %v937_v50, %v936_v49 }
 0x4e7   :  { %v2601_v57 = vadd.f32 %v674_v52, %v2582_v12  ;;  %v938_v52 = vld [vmem:[#allocation7 + $0x360] sm:$0xff] }
 0x4e8   :  { %v2253_v54 = vpop.eup %2252  ;;  %v2598_v55 = vadd.f32 %v673_v53, %v2579_v10  ;;  %v818_v10 = vld [vmem:[#allocation7 + $0x2f0] sm:$0xff]  ;;  %v939_v53 = vld [vmem:[#allocation7 + $0x368] sm:$0xff] }
 0x4e9   :  { %v2255_v56 = vpop.eup %2254  ;;  %v676_v58 = vmul.f32 0.125, %v2253_v54  ;;  %v2109_v12 = vpack.c.bf16 %v819_v11, %v818_v10  ;;  %v2137_v54 = vpack.c.bf16 %v939_v53, %v938_v52 }
 0x4ea   :  { %v675_v59 = vmul.f32 0.125, %v2255_v56  ;;  %1731 = vmatprep.mubr.f32.mxu1 %v2598_v55  ;;  %v941_v56 = vld [vmem:[#allocation7 + $0x378] sm:$0xff] }
 0x4eb   :  { %1732 = vmatmul.mubr.f32.vlgmr.msra.gmra.mrb[8].mxu1 %v2601_v57  ;;  %v2609_v61 = vadd.f32 %v676_v58, %v2590_v16  ;;  %2110 = vmatprep.subr.bf16.mxu0 %v2109_v12  ;;  %v2113_v16 = vpack.c.bf16 %v927_v14, %v926_v13  ;;  %v1048_v58 = vld [vmem:[#allocation7 + $0x380] sm:$0xff] }
 0x4ec   :  { %v2606_v60 = vadd.f32 %v675_v59, %v2587_v15  ;;  %2112 = vmatpush3.bf16.msra.mxu0 %v2109_v12  ;;  %v928_v15 = vld [vmem:[#allocation7 + $0x310] sm:$0xff]  ;;  %v1049_v59 = vld [vmem:[#allocation7 + $0x388] sm:$0xff] }
 0x4ed   :  { %v2117_v18 = vpack.c.bf16 %v929_v17, %v928_v15  ;;  %2114 = vmatprep.subr.bf16.mxu1 %v2113_v16 }
 0x4ee   :  { %1734 = vmatprep.mubr.f32.mxu1 %v2606_v60  ;;  %2116 = vmatpush3.bf16.msra.mxu1 %v2113_v16 }
 0x4ef   :  { %1735 = vmatmul.mubr.f32.gmra.mrb[10].mxu1 %v2609_v61  ;;  %2118 = vmatprep.subr.bf16.mxu1 %v2117_v18 }
 0x4f2   :  { %2120 = vmatpush3.bf16.msra.mxu1 %v2117_v18 }
 0x4f3   :  { %2122 = vmatprep.subr.bf16.mxu1 %v2121_v21 }
 0x4f6   :  { %2124 = vmatpush3.bf16.msra.mxu1 %v2121_v21 }
 0x4f7   :  { %2126 = vmatprep.subr.bf16.mxu1 %v2125_v45 }
 0x4fa   :  { %2128 = vmatpush3.bf16.msra.mxu1 %v2125_v45  ;;  %v1173_v45 = vld [vmem:[#allocation8 + $0x20] sm:$0xff] }
 0x4fb   :  { %2130 = vmatprep.subr.bf16.mxu1 %v2129_v48  ;;  %v2185_v47 = vpack.c.bf16 %v1174_v46, %v1173_v45 }
 0x4fe   :  { %2132 = vmatpush3.bf16.msra.mxu1 %v2129_v48  ;;  %v1306_v48 = vld [vmem:[%s2680_s4 + $0x6] ss:$0 sm:$0xff] }
 0x4ff   :  { %2134 = vmatprep.subr.bf16.mxu1 %v2133_v51 }
 0x502   :  { %2136 = vmatpush3.bf16.msra.mxu1 %v2133_v51 }
 0x503   :  { %2138 = vmatprep.subr.bf16.mxu1 %v2137_v54 }
 0x506   :  { %2140 = vmatpush3.bf16.msra.mxu1 %v2137_v54 }
 0x5be   :  { %v1733_v23 = vpop.f32.mrb[8].mxu1 }
 0x5bf   :  { %v778_v24 = vadd.f32 %v1733_v23, %v1302_v22  ;;  %v772_v25 = vpop.f32.mrb[9].mxu1 }
 0x5c0   :  { %v773_v26 = vadd.f32 %v1302_v22, %v772_v25  ;;  %v1055_v25 = vld [vmem:[#allocation7 + $0x3b8] sm:$0xff] }
 0x5c1   :  { %2256 = vtanh.f32 %v778_v24  ;;  %v1054_v24 = vld [vmem:[#allocation7 + $0x3b0] sm:$0xff] }
 0x5c2   :  { %2258 = vtanh.f32 %v773_v26  ;;  %v1736_v27 = vpop.f32.mrb[10].mxu1  ;;  %v2157_v26 = vpack.c.bf16 %v1055_v25, %v1054_v24 }
 0x5c3   :  { %v788_v28 = vadd.f32 %v1736_v27, %v1302_v22  ;;  %v782_v29 = vpop.f32.mrb[11].mxu1  ;;  %v1056_v27 = vld [vmem:[#allocation7 + $0x3c0] sm:$0xff] }
 0x5c4   :  { %v783_v30 = vadd.f32 %v1302_v22, %v782_v29 }
 0x5c5   :  { %2260 = vtanh.f32 %v788_v28  ;;  %v1057_v28 = vld [vmem:[#allocation7 + $0x3c8] sm:$0xff] }
 0x5c6   :  { %2262 = vtanh.f32 %v783_v30  ;;  %v2161_v29 = vpack.c.bf16 %v1057_v28, %v1056_v27  ;;  %v1058_v30 = vld [vmem:[#allocation7 + $0x3d0] sm:$0xff] }
 0x5cb   :  { %v2257_v31 = vpop.eup %2256 }
 0x5cc   :  { %v2259_v32 = vpop.eup %2258  ;;  %v796_v33 = vmul.f32 0.125, %v2257_v31  ;;  %v1059_v31 = vld [vmem:[#allocation7 + $0x3d8] sm:$0xff] }
 0x5cd   :  { %v795_v34 = vmul.f32 0.125, %v2259_v32  ;;  %v2165_v32 = vpack.c.bf16 %v1059_v31, %v1058_v30 }
 0x5ce   :  { %v2620_v38 = vadd.f32 %v796_v33, %v2601_v57  ;;  %v1060_v33 = vld [vmem:[#allocation7 + $0x3e0] sm:$0xff] }
 0x5cf   :  { %v2261_v35 = vpop.eup %2260  ;;  %v2617_v36 = vadd.f32 %v795_v34, %v2598_v55  ;;  %v940_v55 = vld [vmem:[#allocation7 + $0x370] sm:$0xff]  ;;  %v1061_v34 = vld [vmem:[#allocation7 + $0x3e8] sm:$0xff] }
 0x5d0   :  { %v2263_v37 = vpop.eup %2262  ;;  %v798_v39 = vmul.f32 0.125, %v2261_v35  ;;  %v2141_v57 = vpack.c.bf16 %v941_v56, %v940_v55  ;;  %v2169_v35 = vpack.c.bf16 %v1061_v34, %v1060_v33 }
 0x5d1   :  { %v797_v40 = vmul.f32 0.125, %v2263_v37  ;;  %1769 = vmatprep.mubr.f32.mxu0 %v2617_v36  ;;  %v1063_v37 = vld [vmem:[#allocation7 + $0x3f8] sm:$0xff] }
 0x5d2   :  { %1770 = vmatmul.mubr.f32.vlgmr.msra.gmra.mrb[12].mxu0 %v2620_v38  ;;  %v2628_v42 = vadd.f32 %v798_v39, %v2609_v61  ;;  %2142 = vmatprep.subr.bf16.mxu1 %v2141_v57  ;;  %v2145_v61 = vpack.c.bf16 %v1049_v59, %v1048_v58  ;;  %v1169_v39 = vld [vmem:[#allocation8] sm:$0xff] }
 0x5d3   :  { %v2625_v41 = vadd.f32 %v797_v40, %v2606_v60  ;;  %2144 = vmatpush3.bf16.msra.mxu1 %v2141_v57  ;;  %v1050_v60 = vld [vmem:[#allocation7 + $0x390] sm:$0xff]  ;;  %v1170_v40 = vld [vmem:[#allocation8 + $0x8] sm:$0xff] }
 0x5d4   :  { %v2149_v63 = vpack.c.bf16 %v1051_v62, %v1050_v60  ;;  %2146 = vmatprep.subr.bf16.mxu0 %v2145_v61 }
 0x5d5   :  { %1772 = vmatprep.mubr.f32.mxu0 %v2625_v41  ;;  %2148 = vmatpush3.bf16.msra.mxu0 %v2145_v61 }
 0x5d6   :  { %1773 = vmatmul.mubr.f32.gmra.mrb[14].mxu0 %v2628_v42  ;;  %2150 = vmatprep.subr.bf16.mxu0 %v2149_v63 }
 0x5d9   :  { %2152 = vmatpush3.bf16.msra.mxu0 %v2149_v63 }
 0x5da   :  { %2154 = vmatprep.subr.bf16.mxu0 %v2153_v2 }
 0x5dd   :  { %2156 = vmatpush3.bf16.msra.mxu0 %v2153_v2 }
 0x5de   :  { %2158 = vmatprep.subr.bf16.mxu0 %v2157_v26 }
 0x5e1   :  { %2160 = vmatpush3.bf16.msra.mxu0 %v2157_v26 }
 0x5e2   :  { %2162 = vmatprep.subr.bf16.mxu0 %v2161_v29 }
 0x5e5   :  { %2164 = vmatpush3.bf16.msra.mxu0 %v2161_v29 }
 0x5e6   :  { %2166 = vmatprep.subr.bf16.mxu0 %v2165_v32 }
 0x5e9   :  { %2168 = vmatpush3.bf16.msra.mxu0 %v2165_v32 }
 0x5ea   :  { %2170 = vmatprep.subr.bf16.mxu0 %v2169_v35 }
 0x5ed   :  { %2172 = vmatpush3.bf16.msra.mxu0 %v2169_v35 }
 0x6a5   :  { %v1771_v4 = vpop.f32.mrb[12].mxu0 }
 0x6a6   :  { %v900_v5 = vadd.f32 %v1771_v4, %v1304_v3  ;;  %v894_v6 = vpop.f32.mrb[13].mxu0 }
 0x6a7   :  { %v895_v7 = vadd.f32 %v1304_v3, %v894_v6  ;;  %v1176_v6 = vld [vmem:[#allocation8 + $0x38] sm:$0xff] }
 0x6a8   :  { %2264 = vtanh.f32 %v900_v5  ;;  %v1175_v5 = vld [vmem:[#allocation8 + $0x30] sm:$0xff] }
 0x6a9   :  { %2266 = vtanh.f32 %v895_v7  ;;  %v1774_v8 = vpop.f32.mrb[14].mxu0  ;;  %v2189_v7 = vpack.c.bf16 %v1176_v6, %v1175_v5 }
 0x6aa   :  { %v910_v9 = vadd.f32 %v1774_v8, %v1304_v3  ;;  %v904_v10 = vpop.f32.mrb[15].mxu0  ;;  %v1177_v8 = vld [vmem:[#allocation8 + $0x40] sm:$0xff] }
 0x6ab   :  { %v905_v11 = vadd.f32 %v1304_v3, %v904_v10 }
 0x6ac   :  { %2268 = vtanh.f32 %v910_v9  ;;  %v1178_v9 = vld [vmem:[#allocation8 + $0x48] sm:$0xff] }
 0x6ad   :  { %2270 = vtanh.f32 %v905_v11  ;;  %v2193_v10 = vpack.c.bf16 %v1178_v9, %v1177_v8  ;;  %v1179_v11 = vld [vmem:[#allocation8 + $0x50] sm:$0xff] }
 0x6b2   :  { %v2265_v12 = vpop.eup %2264 }
 0x6b3   :  { %v2267_v13 = vpop.eup %2266  ;;  %v918_v14 = vmul.f32 0.125, %v2265_v12  ;;  %v1180_v12 = vld [vmem:[#allocation8 + $0x58] sm:$0xff] }
 0x6b4   :  { %v917_v15 = vmul.f32 0.125, %v2267_v13  ;;  %v2197_v13 = vpack.c.bf16 %v1180_v12, %v1179_v11 }
 0x6b5   :  { %v2639_v19 = vadd.f32 %v918_v14, %v2620_v38  ;;  %v1181_v14 = vld [vmem:[#allocation8 + $0x60] sm:$0xff] }
 0x6b6   :  { %v2269_v16 = vpop.eup %2268  ;;  %v2636_v17 = vadd.f32 %v917_v15, %v2617_v36  ;;  %v1062_v36 = vld [vmem:[#allocation7 + $0x3f0] sm:$0xff]  ;;  %v1182_v15 = vld [vmem:[#allocation8 + $0x68] sm:$0xff] }
 0x6b7   :  { %v2271_v18 = vpop.eup %2270  ;;  %v920_v20 = vmul.f32 0.125, %v2269_v16  ;;  %v2173_v38 = vpack.c.bf16 %v1063_v37, %v1062_v36  ;;  %v2201_v16 = vpack.c.bf16 %v1182_v15, %v1181_v14 }
 0x6b8   :  { %v919_v21 = vmul.f32 0.125, %v2271_v18  ;;  %1807 = vmatprep.mubr.f32.mxu1 %v2636_v17  ;;  %v1184_v18 = vld [vmem:[#allocation8 + $0x78] sm:$0xff] }
 0x6b9   :  { %1808 = vmatmul.mubr.f32.vlgmr.msra.gmra.mrb[12].mxu1 %v2639_v19  ;;  %v2647_v23 = vadd.f32 %v920_v20, %v2628_v42  ;;  %2174 = vmatprep.subr.bf16.mxu0 %v2173_v38  ;;  %v2177_v42 = vpack.c.bf16 %v1170_v40, %v1169_v39  ;;  %v1308_v20 = vld [vmem:[%s2680_s4 + $0x7] ss:$0 sm:$0xff]  ;;  %s2412_s4 = smov [#allocation10]  }
 0x6ba   :  { %v2644_v22 = vadd.f32 %v919_v21, %v2625_v41  ;;  %2176 = vmatpush3.bf16.msra.mxu0 %v2173_v38  ;;  %v1171_v41 = vld [vmem:[#allocation8 + $0x10] sm:$0xff]  ;;  %s1279_s14 = sshll.u32 %s2412_s4, 4  ;;  %s1280_s14 = int_to_ptr.vmem [resolvable:$true] %s1279_s14 }
 0x6bb   :  { %v2181_v44 = vpack.c.bf16 %v1172_v43, %v1171_v41  ;;  %2178 = vmatprep.subr.bf16.mxu1 %v2177_v42  ;;  %s2376_s15 = scalar_lea.vmem %s1280_s14, 512  ;;  %p2381_p5 = scmp.lt.s32.totalorder %s1280_s14, %s1280_s14 }
 0x6bc   :  { %1810 = vmatprep.mubr.f32.mxu1 %v2644_v22  ;;  %2180 = vmatpush3.bf16.msra.mxu1 %v2177_v42  ;;  %p2377_p4 = scmp.ne.s32.totalorder %s1280_s14, %s2376_s15  ;;  %p2382_p6 = scmp.lt.s32.totalorder %s2376_s15, %s2376_s15 }
 0x6bd   :  { %1811 = vmatmul.mubr.f32.gmra.mrb[14].mxu1 %v2647_v23  ;;  %2182 = vmatprep.subr.bf16.mxu1 %v2181_v44 }
 0x6be   :  { %p2383_p7 = por %p2382_p6, %p2381_p5 }
 0x6c0   :  { %2184 = vmatpush3.bf16.msra.mxu1 %v2181_v44  ;;  %p2384_p8 = pnand %p2383_p7, %p2377_p4 }
 0x6c1   :  { %2186 = vmatprep.subr.bf16.mxu1 %v2185_v47 }
 0x6c4   :  { %2188 = vmatpush3.bf16.msra.mxu1 %v2185_v47 }
 0x6c5   :  { %2190 = vmatprep.subr.bf16.mxu1 %v2189_v7 }
 0x6c8   :  { %2192 = vmatpush3.bf16.msra.mxu1 %v2189_v7 }
 0x6c9   :  { %2194 = vmatprep.subr.bf16.mxu1 %v2193_v10 }
 0x6cc   :  { %2196 = vmatpush3.bf16.msra.mxu1 %v2193_v10 }
 0x6cd   :  { %2198 = vmatprep.subr.bf16.mxu1 %v2197_v13 }
 0x6d0   :  { %2200 = vmatpush3.bf16.msra.mxu1 %v2197_v13 }
 0x6d1   :  { %2202 = vmatprep.subr.bf16.mxu1 %v2201_v16 }
 0x6d4   :  { %2204 = vmatpush3.bf16.msra.mxu1 %v2201_v16 }
 0x78c   :  { %v1809_v49 = vpop.f32.mrb[12].mxu1 }
 0x78d   :  { %v1022_v50 = vadd.f32 %v1809_v49, %v1306_v48  ;;  %v1016_v51 = vpop.f32.mrb[13].mxu1 }
 0x78e   :  { %v1017_v52 = vadd.f32 %v1306_v48, %v1016_v51 }
 0x78f   :  { %2272 = vtanh.f32 %v1022_v50 }
 0x790   :  { %2274 = vtanh.f32 %v1017_v52  ;;  %v1812_v53 = vpop.f32.mrb[14].mxu1 }
 0x791   :  { %v1032_v54 = vadd.f32 %v1812_v53, %v1306_v48  ;;  %v1026_v55 = vpop.f32.mrb[15].mxu1 }
 0x792   :  { %v1027_v56 = vadd.f32 %v1306_v48, %v1026_v55 }
 0x793   :  { %2276 = vtanh.f32 %v1032_v54 }
 0x794   :  { %2278 = vtanh.f32 %v1027_v56 }
 0x799   :  { %v2273_v57 = vpop.eup %2272 }
 0x79a   :  { %v2275_v58 = vpop.eup %2274  ;;  %v1040_v59 = vmul.f32 0.125, %v2273_v57 }
 0x79b   :  { %v1039_v60 = vmul.f32 0.125, %v2275_v58 }
 0x79c   :  { %v1044_v0 = vadd.f32 %v1040_v59, %v2639_v19 }
 0x79d   :  { %v2277_v61 = vpop.eup %2276  ;;  %v1043_v62 = vadd.f32 %v1039_v60, %v2636_v17  ;;  %v1183_v17 = vld [vmem:[#allocation8 + $0x70] sm:$0xff] }
 0x79e   :  { %v2279_v63 = vpop.eup %2278  ;;  %v1042_v1 = vmul.f32 0.125, %v2277_v61  ;;  %v2205_v19 = vpack.c.bf16 %v1184_v18, %v1183_v17 }
 0x79f   :  { %v1041_v2 = vmul.f32 0.125, %v2279_v63  ;;  %1845 = vmatprep.mubr.f32.mxu0 %v1043_v62 }
 0x7a0   :  { %1846 = vmatmul.mubr.f32.vlgmr.msra.gmra.mrb[16].mxu0 %v1044_v0  ;;  %v1046_v4 = vadd.f32 %v1042_v1, %v2647_v23  ;;  %2206 = vmatprep.subr.bf16.mxu1 %v2205_v19 }
 0x7a1   :  { %v1045_v3 = vadd.f32 %v1041_v2, %v2644_v22  ;;  %2208 = vmatpush3.bf16.msra.mxu1 %v2205_v19 }
 0x7a3   :  { %1848 = vmatprep.mubr.f32.mxu0 %v1045_v3 }
 0x7a4   :  { %1849 = vmatmul.mubr.f32.gmra.mrb[18].mxu0 %v1046_v4 }
 0x873   :  { %v1847_v21 = vpop.f32.mrb[16].mxu0 }
 0x874   :  { %v1144_v22 = vadd.f32 %v1847_v21, %v1308_v20  ;;  %v1138_v23 = vpop.f32.mrb[17].mxu0 }
 0x875   :  { %v1139_v24 = vadd.f32 %v1308_v20, %v1138_v23 }
 0x876   :  { %2280 = vtanh.f32 %v1144_v22 }
 0x877   :  { %2282 = vtanh.f32 %v1139_v24  ;;  %v1850_v25 = vpop.f32.mrb[18].mxu0 }
 0x878   :  { %v1154_v26 = vadd.f32 %v1850_v25, %v1308_v20  ;;  %v1148_v27 = vpop.f32.mrb[19].mxu0 }
 0x879   :  { %v1149_v28 = vadd.f32 %v1308_v20, %v1148_v27 }
 0x87a   :  { %2284 = vtanh.f32 %v1154_v26 }
 0x87b   :  { %2286 = vtanh.f32 %v1149_v28 }
 0x880   :  { %v2281_v29 = vpop.eup %2280 }
 0x881   :  { %v2283_v30 = vpop.eup %2282  ;;  %v1162_v31 = vmul.f32 0.125, %v2281_v29 }
 0x882   :  { %v1161_v32 = vmul.f32 0.125, %v2283_v30 }
 0x883   :  { %v1166_v36 = vadd.f32 %v1162_v31, %v1044_v0 }
 0x884   :  { %v2285_v33 = vpop.eup %2284  ;;  %v1165_v34 = vadd.f32 %v1161_v32, %v1043_v62 }
 0x885   :  { %v2287_v35 = vpop.eup %2286  ;;  %v1164_v37 = vmul.f32 0.125, %v2285_v33 }
 0x886   :  { %v1163_v38 = vmul.f32 0.125, %v2287_v35  ;;  %1883 = vmatprep.mubr.f32.mxu1 %v1165_v34 }
 0x887   :  { %1884 = vmatmul.mubr.f32.vlgmr.msra.gmra.mrb[16].mxu1 %v1166_v36  ;;  %v1168_v40 = vadd.f32 %v1164_v37, %v1046_v4 }
 0x888   :  { %v1167_v39 = vadd.f32 %v1163_v38, %v1045_v3 }
 0x88a   :  { %1886 = vmatprep.mubr.f32.mxu1 %v1167_v39 }
 0x88b   :  { %1887 = vmatmul.mubr.f32.gmra.mrb[18].mxu1 %v1168_v40 }
 0x95a   :  { %v1885_v41 = vpop.f32.mrb[16].mxu1 }
 0x95b   :  { %1271 = vst [vmem:[#allocation10 + $0x8] sm:$0xff] %v1885_v41  ;;  %v1251_v42 = vpop.f32.mrb[17].mxu1 }
 0x95c   :  { %1270 = vst [vmem:[#allocation10] sm:$0xff] %v1251_v42 }
 0x95e   :  { %v1888_v43 = vpop.f32.mrb[18].mxu1 }
 0x95f   :  { %1273 = vst [vmem:[#allocation10 + $0x18] sm:$0xff] %v1888_v43  ;;  %v1261_v44 = vpop.f32.mrb[19].mxu1 }
 0x960   :  { %1272 = vst [vmem:[#allocation10 + $0x10] sm:$0xff] %v1261_v44 }
 0x961   :  { %2387 = shalt.err (!%p2384_p8)
}
 0x962   :  { %s2388_s18 = scalar_lea.hbm %s2682_s6, 512 }
 0x963   :  { %p2389_p9 = scmp.ne.s32.totalorder %s2682_s6, %s2388_s18  ;;  %p2392_p10 = scmp.lt.u32.totalorder %s2388_s18, %s2682_s6 }
 0x965   :  { %p2394_p11 = pnand %p2392_p10, %p2389_p9 }
 0x967   :  { %2397 = shalt.err (!%p2394_p11)
}
 0x968   :  { %1285 = dma.vmem_to_hbm [thread:$0]  %s1280_s14, 512, %s2682_s6, [#allocation4], %s2408_s9, %s2408_s9, %s2409_s10  }
 0x969   :  { %2404 = dma.done.wait [#allocation4], 512  }
 0x96a   :  { %2405 = vsyncadd [#allocation4], 4294966784 }
 0x96b   :  { %1289 = vsyncpa [#allocation3], 1 }
 0x96c   :  { %1290 = vsyncpa [#allocation6], 1 }
 0x96d   :  { %1291 = vsyncpa [#allocation9], 1 }
 0x96e   :  { %1292 = vsyncpa [#allocation4], 1 }

</bundles_post_ra>
